<compile_context>
chip_gen: v7x
topology: tpu7x:2x2x1
jax: 0.10.0
libtpu: 0.0.40
codegen_flags: <defaults>
</compile_context>

<pallas_src>
import math
from functools import partial

import jax
import jax.numpy as jnp
from jax.experimental import pallas as pl
from jax.experimental.pallas import tpu as pltpu


_SUBLANES = 8            # f32 sublanes per vreg
_INNER_LANES = 512       # lanes per inner-loop chunk (4 vregs per array)
_COLS_PER_CHUNK = _SUBLANES * _INNER_LANES   # 4096 columns


def _round_up(x, m):
    return ((x + m - 1) // m) * m


def _cdiv(a, b):
    return -(-a // b)


# ---------------------------------------------------------------------------
# Pallas kernels.  Feature block: (F, 8, L) f32; output block: (8, L) f32.
# All parameters arrive as a flat f32 vector in SMEM (scalar reads).
# ---------------------------------------------------------------------------

def _score_nonlinear_kernel(p_ref, feat_ref, out_ref):
    """scores = Linear(F,1)(ReLU(Linear(2F,F)(ReLU(Linear(F,2F)(w*x)))))."""
    f = feat_ref.shape[0]
    hid = 2 * f
    # Parameter layout in p_ref (SMEM, flat f32):
    #   w1 (hid*f) | b1 (hid) | w2 (f*hid) | b2 (f) | w3 (f) | b3 (1)
    o_w1 = 0
    o_b1 = o_w1 + hid * f
    o_w2 = o_b1 + hid
    o_b2 = o_w2 + f * hid
    o_w3 = o_b2 + f
    o_b3 = o_w3 + f

    trips = out_ref.shape[-1] // _INNER_LANES

    @pl.loop(0, trips)
    def _(c):
        off = pl.multiple_of(c * _INNER_LANES, _INNER_LANES)
        x = [feat_ref[j, :, pl.ds(off, _INNER_LANES)] for j in range(f)]

        # Linear(F, 2F) + ReLU.  (Per-feature `weights` already folded in.)
        h1 = []
        for k in range(hid):
            acc = x[0] * p_ref[o_w1 + k * f]
            for j in range(1, f):
                acc = acc + x[j] * p_ref[o_w1 + k * f + j]
            h1.append(jnp.maximum(acc + p_ref[o_b1 + k], 0.0))

        # Dropout(0.1) -> identity in eval mode.
        # TODO(synk): training-mode dropout (Bernoulli mask + 1/(1-p) scale).

        # Linear(2F, F) + ReLU.
        h2 = []
        for i in range(f):
            acc = h1[0] * p_ref[o_w2 + i * hid]
            for k in range(1, hid):
                acc = acc + h1[k] * p_ref[o_w2 + i * hid + k]
            h2.append(jnp.maximum(acc + p_ref[o_b2 + i], 0.0))

        # Linear(F, 1).
        out = h2[0] * p_ref[o_w3]
        for i in range(1, f):
            out = out + h2[i] * p_ref[o_w3 + i]
        out_ref[:, pl.ds(off, _INNER_LANES)] = (
            out + p_ref[o_b3]).astype(out_ref.dtype)


def _score_linear_kernel(p_ref, feat_ref, out_ref):
    """scores = (features * weights).sum(dim=1)."""
    f = feat_ref.shape[0]
    trips = out_ref.shape[-1] // _INNER_LANES

    @pl.loop(0, trips)
    def _(c):
        off = pl.multiple_of(c * _INNER_LANES, _INNER_LANES)
        acc = feat_ref[0, :, pl.ds(off, _INNER_LANES)] * p_ref[0]
        for j in range(1, f):
            acc = acc + feat_ref[j, :, pl.ds(off, _INNER_LANES)] * p_ref[j]
        out_ref[:, pl.ds(off, _INNER_LANES)] = acc.astype(out_ref.dtype)


# ---------------------------------------------------------------------------
# Parameter construction (mirrors PyTorch __init__, PyTorch weight layout)
# ---------------------------------------------------------------------------

def _xavier_uniform(key, out_features, in_features):
    bound = math.sqrt(6.0 / (in_features + out_features))
    return jax.random.uniform(key, (out_features, in_features),
                              dtype=jnp.float32, minval=-bound, maxval=bound)


def init_superpoint_score_params(num_features, key, init_weights=None,
                                 use_nonlinear=True):
    f = num_features
    if init_weights is not None:
        weights = jnp.asarray(init_weights, jnp.float32).reshape(f)
    else:
        weights = jnp.ones((f,), jnp.float32)
    params = {"weights": weights}
    if use_nonlinear:
        k1, k2, k3 = jax.random.split(key, 3)
        hid = 2 * f
        params["W1"] = _xavier_uniform(k1, hid, f)     # (2F, F)
        params["b1"] = jnp.zeros((hid,), jnp.float32)
        params["W2"] = _xavier_uniform(k2, f, hid)     # (F, 2F)
        params["b2"] = jnp.zeros((f,), jnp.float32)
        params["W3"] = _xavier_uniform(k3, 1, f)       # (1, F)
        params["b3"] = jnp.zeros((1,), jnp.float32)
    return params


def prepare_kernel_params(params, use_nonlinear=True):
    """Pack module params into one flat SMEM vector (weights folded into W1).

    Rebuild whenever `weights` / W* / b* change (staleness trap otherwise).
    """
    weights = params["weights"].astype(jnp.float32)
    if not use_nonlinear:
        return {"p": weights}                                     # (F,)
    w1 = (params["W1"] * weights[None, :]).reshape(-1)            # (2F*F,)
    p = jnp.concatenate([
        w1,
        params["b1"].reshape(-1),
        params["W2"].reshape(-1),
        params["b2"].reshape(-1),
        params["W3"].reshape(-1),
        params["b3"].reshape(-1),
    ]).astype(jnp.float32)
    return {"p": p}


# ---------------------------------------------------------------------------
# Wrapper (jitted so the transpose/pad/reshape fuse with the pallas_call)
# ---------------------------------------------------------------------------

@partial(jax.jit, static_argnames=("use_nonlinear", "tile_n", "transposed"))
def superpoint_score_forward(features, kparams, use_nonlinear=True,
                             tile_n=32768, transposed=False):
    """features: (N, F) f32 (or (F, N) if transposed=True).  Returns (N,)."""
    if transposed:
        f, n = features.shape
        feat_t = features.astype(jnp.float32)
    else:
        n, f = features.shape
        # Fused with pad/reshape under this jit (single copy); prefer passing
        # features already as (F, N) via transposed=True to skip it entirely.
        feat_t = features.astype(jnp.float32).T

    # Tile derivation: cap per-step columns at tile_n, but size the tile from
    # N so the last block wastes at most one 4096-column chunk of padding.
    tile_cap = max(_round_up(tile_n, _COLS_PER_CHUNK), _COLS_PER_CHUNK)
    num_tiles = max(1, _cdiv(n, tile_cap))
    tile = _round_up(_cdiv(n, num_tiles), _COLS_PER_CHUNK)
    n_pad = num_tiles * tile
    lanes = tile // _SUBLANES

    feat_t = jnp.pad(feat_t, ((0, 0), (0, n_pad - n)))
    feat_t = feat_t.reshape(f, _SUBLANES, n_pad // _SUBLANES)

    param_spec = pl.BlockSpec(memory_space=pltpu.MemorySpace.SMEM)
    feat_spec = pl.BlockSpec((f, _SUBLANES, lanes), lambda i: (0, 0, i))
    out_spec = pl.BlockSpec((_SUBLANES, lanes), lambda i: (0, i))

    kernel = _score_nonlinear_kernel if use_nonlinear else _score_linear_kernel

    out = pl.pallas_call(
        kernel,
        out_shape=jax.ShapeDtypeStruct((_SUBLANES, n_pad // _SUBLANES),
                                       jnp.float32),
        grid=(num_tiles,),
        in_specs=[param_spec, feat_spec],
        out_specs=out_spec,
        compiler_params=pltpu.CompilerParams(
            dimension_semantics=("parallel",)),
    )(kparams["p"], feat_t)

    # (8, n_pad/8) row-major flatten restores the original column order.
    return out.reshape(n_pad)[:n]


# ---------------------------------------------------------------------------
# Pure-JAX reference for sanity check
# ---------------------------------------------------------------------------

def _reference(features, params, use_nonlinear=True):
    x = features * params["weights"][None, :]
    if not use_nonlinear:
        return jnp.sum(x, axis=-1)
    h = jnp.maximum(x @ params["W1"].T + params["b1"], 0.0)
    h = jnp.maximum(h @ params["W2"].T + params["b2"], 0.0)
    h = h @ params["W3"].T + params["b3"]
    return h[:, 0]


if __name__ == "__main__":
    key = jax.random.PRNGKey(0)
    k_feat, k_params = jax.random.split(key)

    # N superpoints; F features (density, variance, mean, gradient).
    N, F = 300, 4
    features = jax.random.normal(k_feat, (N, F), dtype=jnp.float32)
    params = init_superpoint_score_params(F, k_params, use_nonlinear=True)

    # Nonlinear path (MLP head), standard (N, F) input.
    kparams = prepare_kernel_params(params, use_nonlinear=True)
    scores = superpoint_score_forward(features, kparams, use_nonlinear=True)
    jax.block_until_ready(scores)
    ref = _reference(features, params, use_nonlinear=True)
    assert scores.shape == (N,)
    assert jnp.allclose(scores, ref, atol=1e-5, rtol=1e-4)

    # Same path with producer-side (F, N) layout (no wrapper transpose).
    scores_t = superpoint_score_forward(features.T, kparams,
                                        use_nonlinear=True, transposed=True)
    jax.block_until_ready(scores_t)
    assert jnp.allclose(scores_t, ref, atol=1e-5, rtol=1e-4)

    # Linear path (compute_superpoint_score).
    kparams_lin = prepare_kernel_params(params, use_nonlinear=False)
    scores_lin = superpoint_score_forward(features, kparams_lin,
                                          use_nonlinear=False)
    jax.block_until_ready(scores_lin)
    ref_lin = _reference(features, params, use_nonlinear=False)
    assert scores_lin.shape == (N,)
    assert jnp.allclose(scores_lin, ref_lin, atol=1e-5, rtol=1e-4)

    print("KERNEL_OK")
</pallas_src>

<mosaic_0001>
module attributes {stable_mosaic.version = 11 : i64} {
  func.func @_score_nonlinear_kernel(%arg0: i32, %arg1: memref<81xf32, #tpu.memory_space<smem>>, %arg2: memref<4x8x512xf32, #tpu.memory_space<vmem>>, %arg3: memref<8x512xf32, #tpu.memory_space<vmem>>) attributes {dimension_semantics = [#tpu.dimension_semantics<parallel>], iteration_bounds = array<i64: 1>, scalar_prefetch = 0 : i64, scratch_operands = 0 : i64, tpu.core_type = #tpu.core_type<tc>, window_params = [{transform_indices = @transform_0, window_bounds = array<i64: 81>}, {transform_indices = @transform_1, window_bounds = array<i64: 4, 8, 512>}, {transform_indices = @transform_2, window_bounds = array<i64: 8, 512>}]} {
    %c0_i32 = arith.constant 0 : i32
    %c1_i32 = arith.constant 1 : i32
    %0 = arith.muli %c0_i32, %c1_i32 : i32
    %c0_i32_0 = arith.constant 0 : i32
    %1 = arith.addi %c0_i32_0, %0 : i32
    %c512_i32 = arith.constant 512 : i32
    %2 = arith.muli %1, %c512_i32 : i32
    %3 = tpu.assume_multiple %2, 512 : i32
    %c0 = arith.constant 0 : index
    %c0_1 = arith.constant 0 : index
    %4 = arith.index_cast %3 : i32 to index
    %5 = vector.load %arg2[%c0, %c0_1, %4] : memref<4x8x512xf32, #tpu.memory_space<vmem>>, vector<1x8x512xf32>
    %6 = vector.shape_cast %5 : vector<1x8x512xf32> to vector<8x512xf32>
    %c1 = arith.constant 1 : index
    %c0_2 = arith.constant 0 : index
    %7 = arith.index_cast %3 : i32 to index
    %8 = vector.load %arg2[%c1, %c0_2, %7] : memref<4x8x512xf32, #tpu.memory_space<vmem>>, vector<1x8x512xf32>
    %9 = vector.shape_cast %8 : vector<1x8x512xf32> to vector<8x512xf32>
    %c2 = arith.constant 2 : index
    %c0_3 = arith.constant 0 : index
    %10 = arith.index_cast %3 : i32 to index
    %11 = vector.load %arg2[%c2, %c0_3, %10] : memref<4x8x512xf32, #tpu.memory_space<vmem>>, vector<1x8x512xf32>
    %12 = vector.shape_cast %11 : vector<1x8x512xf32> to vector<8x512xf32>
    %c3 = arith.constant 3 : index
    %c0_4 = arith.constant 0 : index
    %13 = arith.index_cast %3 : i32 to index
    %14 = vector.load %arg2[%c3, %c0_4, %13] : memref<4x8x512xf32, #tpu.memory_space<vmem>>, vector<1x8x512xf32>
    %15 = vector.shape_cast %14 : vector<1x8x512xf32> to vector<8x512xf32>
    %c0_5 = arith.constant 0 : index
    %16 = memref.load %arg1[%c0_5] : memref<81xf32, #tpu.memory_space<smem>>
    %17 = vector.broadcast %16 : f32 to vector<8x512xf32>
    %18 = arith.mulf %6, %17 : vector<8x512xf32>
    %c1_6 = arith.constant 1 : index
    %19 = memref.load %arg1[%c1_6] : memref<81xf32, #tpu.memory_space<smem>>
    %20 = vector.broadcast %19 : f32 to vector<8x512xf32>
    %21 = arith.mulf %9, %20 : vector<8x512xf32>
    %22 = arith.addf %18, %21 : vector<8x512xf32>
    %c2_7 = arith.constant 2 : index
    %23 = memref.load %arg1[%c2_7] : memref<81xf32, #tpu.memory_space<smem>>
    %24 = vector.broadcast %23 : f32 to vector<8x512xf32>
    %25 = arith.mulf %12, %24 : vector<8x512xf32>
    %26 = arith.addf %22, %25 : vector<8x512xf32>
    %c3_8 = arith.constant 3 : index
    %27 = memref.load %arg1[%c3_8] : memref<81xf32, #tpu.memory_space<smem>>
    %28 = vector.broadcast %27 : f32 to vector<8x512xf32>
    %29 = arith.mulf %15, %28 : vector<8x512xf32>
    %30 = arith.addf %26, %29 : vector<8x512xf32>
    %c32 = arith.constant 32 : index
    %31 = memref.load %arg1[%c32] : memref<81xf32, #tpu.memory_space<smem>>
    %32 = vector.broadcast %31 : f32 to vector<8x512xf32>
    %33 = arith.addf %30, %32 : vector<8x512xf32>
    %cst = arith.constant 0.000000e+00 : f32
    %34 = vector.broadcast %cst : f32 to vector<8x512xf32>
    %35 = arith.maximumf %33, %34 : vector<8x512xf32>
    %c4 = arith.constant 4 : index
    %36 = memref.load %arg1[%c4] : memref<81xf32, #tpu.memory_space<smem>>
    %37 = vector.broadcast %36 : f32 to vector<8x512xf32>
    %38 = arith.mulf %6, %37 : vector<8x512xf32>
    %c5 = arith.constant 5 : index
    %39 = memref.load %arg1[%c5] : memref<81xf32, #tpu.memory_space<smem>>
    %40 = vector.broadcast %39 : f32 to vector<8x512xf32>
    %41 = arith.mulf %9, %40 : vector<8x512xf32>
    %42 = arith.addf %38, %41 : vector<8x512xf32>
    %c6 = arith.constant 6 : index
    %43 = memref.load %arg1[%c6] : memref<81xf32, #tpu.memory_space<smem>>
    %44 = vector.broadcast %43 : f32 to vector<8x512xf32>
    %45 = arith.mulf %12, %44 : vector<8x512xf32>
    %46 = arith.addf %42, %45 : vector<8x512xf32>
    %c7 = arith.constant 7 : index
    %47 = memref.load %arg1[%c7] : memref<81xf32, #tpu.memory_space<smem>>
    %48 = vector.broadcast %47 : f32 to vector<8x512xf32>
    %49 = arith.mulf %15, %48 : vector<8x512xf32>
    %50 = arith.addf %46, %49 : vector<8x512xf32>
    %c33 = arith.constant 33 : index
    %51 = memref.load %arg1[%c33] : memref<81xf32, #tpu.memory_space<smem>>
    %52 = vector.broadcast %51 : f32 to vector<8x512xf32>
    %53 = arith.addf %50, %52 : vector<8x512xf32>
    %cst_9 = arith.constant 0.000000e+00 : f32
    %54 = vector.broadcast %cst_9 : f32 to vector<8x512xf32>
    %55 = arith.maximumf %53, %54 : vector<8x512xf32>
    %c8 = arith.constant 8 : index
    %56 = memref.load %arg1[%c8] : memref<81xf32, #tpu.memory_space<smem>>
    %57 = vector.broadcast %56 : f32 to vector<8x512xf32>
    %58 = arith.mulf %6, %57 : vector<8x512xf32>
    %c9 = arith.constant 9 : index
    %59 = memref.load %arg1[%c9] : memref<81xf32, #tpu.memory_space<smem>>
    %60 = vector.broadcast %59 : f32 to vector<8x512xf32>
    %61 = arith.mulf %9, %60 : vector<8x512xf32>
    %62 = arith.addf %58, %61 : vector<8x512xf32>
    %c10 = arith.constant 10 : index
    %63 = memref.load %arg1[%c10] : memref<81xf32, #tpu.memory_space<smem>>
    %64 = vector.broadcast %63 : f32 to vector<8x512xf32>
    %65 = arith.mulf %12, %64 : vector<8x512xf32>
    %66 = arith.addf %62, %65 : vector<8x512xf32>
    %c11 = arith.constant 11 : index
    %67 = memref.load %arg1[%c11] : memref<81xf32, #tpu.memory_space<smem>>
    %68 = vector.broadcast %67 : f32 to vector<8x512xf32>
    %69 = arith.mulf %15, %68 : vector<8x512xf32>
    %70 = arith.addf %66, %69 : vector<8x512xf32>
    %c34 = arith.constant 34 : index
    %71 = memref.load %arg1[%c34] : memref<81xf32, #tpu.memory_space<smem>>
    %72 = vector.broadcast %71 : f32 to vector<8x512xf32>
    %73 = arith.addf %70, %72 : vector<8x512xf32>
    %cst_10 = arith.constant 0.000000e+00 : f32
    %74 = vector.broadcast %cst_10 : f32 to vector<8x512xf32>
    %75 = arith.maximumf %73, %74 : vector<8x512xf32>
    %c12 = arith.constant 12 : index
    %76 = memref.load %arg1[%c12] : memref<81xf32, #tpu.memory_space<smem>>
    %77 = vector.broadcast %76 : f32 to vector<8x512xf32>
    %78 = arith.mulf %6, %77 : vector<8x512xf32>
    %c13 = arith.constant 13 : index
    %79 = memref.load %arg1[%c13] : memref<81xf32, #tpu.memory_space<smem>>
    %80 = vector.broadcast %79 : f32 to vector<8x512xf32>
    %81 = arith.mulf %9, %80 : vector<8x512xf32>
    %82 = arith.addf %78, %81 : vector<8x512xf32>
    %c14 = arith.constant 14 : index
    %83 = memref.load %arg1[%c14] : memref<81xf32, #tpu.memory_space<smem>>
    %84 = vector.broadcast %83 : f32 to vector<8x512xf32>
    %85 = arith.mulf %12, %84 : vector<8x512xf32>
    %86 = arith.addf %82, %85 : vector<8x512xf32>
    %c15 = arith.constant 15 : index
    %87 = memref.load %arg1[%c15] : memref<81xf32, #tpu.memory_space<smem>>
    %88 = vector.broadcast %87 : f32 to vector<8x512xf32>
    %89 = arith.mulf %15, %88 : vector<8x512xf32>
    %90 = arith.addf %86, %89 : vector<8x512xf32>
    %c35 = arith.constant 35 : index
    %91 = memref.load %arg1[%c35] : memref<81xf32, #tpu.memory_space<smem>>
    %92 = vector.broadcast %91 : f32 to vector<8x512xf32>
    %93 = arith.addf %90, %92 : vector<8x512xf32>
    %cst_11 = arith.constant 0.000000e+00 : f32
    %94 = vector.broadcast %cst_11 : f32 to vector<8x512xf32>
    %95 = arith.maximumf %93, %94 : vector<8x512xf32>
    %c16 = arith.constant 16 : index
    %96 = memref.load %arg1[%c16] : memref<81xf32, #tpu.memory_space<smem>>
    %97 = vector.broadcast %96 : f32 to vector<8x512xf32>
    %98 = arith.mulf %6, %97 : vector<8x512xf32>
    %c17 = arith.constant 17 : index
    %99 = memref.load %arg1[%c17] : memref<81xf32, #tpu.memory_space<smem>>
    %100 = vector.broadcast %99 : f32 to vector<8x512xf32>
    %101 = arith.mulf %9, %100 : vector<8x512xf32>
    %102 = arith.addf %98, %101 : vector<8x512xf32>
    %c18 = arith.constant 18 : index
    %103 = memref.load %arg1[%c18] : memref<81xf32, #tpu.memory_space<smem>>
    %104 = vector.broadcast %103 : f32 to vector<8x512xf32>
    %105 = arith.mulf %12, %104 : vector<8x512xf32>
    %106 = arith.addf %102, %105 : vector<8x512xf32>
    %c19 = arith.constant 19 : index
    %107 = memref.load %arg1[%c19] : memref<81xf32, #tpu.memory_space<smem>>
    %108 = vector.broadcast %107 : f32 to vector<8x512xf32>
    %109 = arith.mulf %15, %108 : vector<8x512xf32>
    %110 = arith.addf %106, %109 : vector<8x512xf32>
    %c36 = arith.constant 36 : index
    %111 = memref.load %arg1[%c36] : memref<81xf32, #tpu.memory_space<smem>>
    %112 = vector.broadcast %111 : f32 to vector<8x512xf32>
    %113 = arith.addf %110, %112 : vector<8x512xf32>
    %cst_12 = arith.constant 0.000000e+00 : f32
    %114 = vector.broadcast %cst_12 : f32 to vector<8x512xf32>
    %115 = arith.maximumf %113, %114 : vector<8x512xf32>
    %c20 = arith.constant 20 : index
    %116 = memref.load %arg1[%c20] : memref<81xf32, #tpu.memory_space<smem>>
    %117 = vector.broadcast %116 : f32 to vector<8x512xf32>
    %118 = arith.mulf %6, %117 : vector<8x512xf32>
    %c21 = arith.constant 21 : index
    %119 = memref.load %arg1[%c21] : memref<81xf32, #tpu.memory_space<smem>>
    %120 = vector.broadcast %119 : f32 to vector<8x512xf32>
    %121 = arith.mulf %9, %120 : vector<8x512xf32>
    %122 = arith.addf %118, %121 : vector<8x512xf32>
    %c22 = arith.constant 22 : index
    %123 = memref.load %arg1[%c22] : memref<81xf32, #tpu.memory_space<smem>>
    %124 = vector.broadcast %123 : f32 to vector<8x512xf32>
    %125 = arith.mulf %12, %124 : vector<8x512xf32>
    %126 = arith.addf %122, %125 : vector<8x512xf32>
    %c23 = arith.constant 23 : index
    %127 = memref.load %arg1[%c23] : memref<81xf32, #tpu.memory_space<smem>>
    %128 = vector.broadcast %127 : f32 to vector<8x512xf32>
    %129 = arith.mulf %15, %128 : vector<8x512xf32>
    %130 = arith.addf %126, %129 : vector<8x512xf32>
    %c37 = arith.constant 37 : index
    %131 = memref.load %arg1[%c37] : memref<81xf32, #tpu.memory_space<smem>>
    %132 = vector.broadcast %131 : f32 to vector<8x512xf32>
    %133 = arith.addf %130, %132 : vector<8x512xf32>
    %cst_13 = arith.constant 0.000000e+00 : f32
    %134 = vector.broadcast %cst_13 : f32 to vector<8x512xf32>
    %135 = arith.maximumf %133, %134 : vector<8x512xf32>
    %c24 = arith.constant 24 : index
    %136 = memref.load %arg1[%c24] : memref<81xf32, #tpu.memory_space<smem>>
    %137 = vector.broadcast %136 : f32 to vector<8x512xf32>
    %138 = arith.mulf %6, %137 : vector<8x512xf32>
    %c25 = arith.constant 25 : index
    %139 = memref.load %arg1[%c25] : memref<81xf32, #tpu.memory_space<smem>>
    %140 = vector.broadcast %139 : f32 to vector<8x512xf32>
    %141 = arith.mulf %9, %140 : vector<8x512xf32>
    %142 = arith.addf %138, %141 : vector<8x512xf32>
    %c26 = arith.constant 26 : index
    %143 = memref.load %arg1[%c26] : memref<81xf32, #tpu.memory_space<smem>>
    %144 = vector.broadcast %143 : f32 to vector<8x512xf32>
    %145 = arith.mulf %12, %144 : vector<8x512xf32>
    %146 = arith.addf %142, %145 : vector<8x512xf32>
    %c27 = arith.constant 27 : index
    %147 = memref.load %arg1[%c27] : memref<81xf32, #tpu.memory_space<smem>>
    %148 = vector.broadcast %147 : f32 to vector<8x512xf32>
    %149 = arith.mulf %15, %148 : vector<8x512xf32>
    %150 = arith.addf %146, %149 : vector<8x512xf32>
    %c38 = arith.constant 38 : index
    %151 = memref.load %arg1[%c38] : memref<81xf32, #tpu.memory_space<smem>>
    %152 = vector.broadcast %151 : f32 to vector<8x512xf32>
    %153 = arith.addf %150, %152 : vector<8x512xf32>
    %cst_14 = arith.constant 0.000000e+00 : f32
    %154 = vector.broadcast %cst_14 : f32 to vector<8x512xf32>
    %155 = arith.maximumf %153, %154 : vector<8x512xf32>
    %c28 = arith.constant 28 : index
    %156 = memref.load %arg1[%c28] : memref<81xf32, #tpu.memory_space<smem>>
    %157 = vector.broadcast %156 : f32 to vector<8x512xf32>
    %158 = arith.mulf %6, %157 : vector<8x512xf32>
    %c29 = arith.constant 29 : index
    %159 = memref.load %arg1[%c29] : memref<81xf32, #tpu.memory_space<smem>>
    %160 = vector.broadcast %159 : f32 to vector<8x512xf32>
    %161 = arith.mulf %9, %160 : vector<8x512xf32>
    %162 = arith.addf %158, %161 : vector<8x512xf32>
    %c30 = arith.constant 30 : index
    %163 = memref.load %arg1[%c30] : memref<81xf32, #tpu.memory_space<smem>>
    %164 = vector.broadcast %163 : f32 to vector<8x512xf32>
    %165 = arith.mulf %12, %164 : vector<8x512xf32>
    %166 = arith.addf %162, %165 : vector<8x512xf32>
    %c31 = arith.constant 31 : index
    %167 = memref.load %arg1[%c31] : memref<81xf32, #tpu.memory_space<smem>>
    %168 = vector.broadcast %167 : f32 to vector<8x512xf32>
    %169 = arith.mulf %15, %168 : vector<8x512xf32>
    %170 = arith.addf %166, %169 : vector<8x512xf32>
    %c39 = arith.constant 39 : index
    %171 = memref.load %arg1[%c39] : memref<81xf32, #tpu.memory_space<smem>>
    %172 = vector.broadcast %171 : f32 to vector<8x512xf32>
    %173 = arith.addf %170, %172 : vector<8x512xf32>
    %cst_15 = arith.constant 0.000000e+00 : f32
    %174 = vector.broadcast %cst_15 : f32 to vector<8x512xf32>
    %175 = arith.maximumf %173, %174 : vector<8x512xf32>
    %c40 = arith.constant 40 : index
    %176 = memref.load %arg1[%c40] : memref<81xf32, #tpu.memory_space<smem>>
    %177 = vector.broadcast %176 : f32 to vector<8x512xf32>
    %178 = arith.mulf %35, %177 : vector<8x512xf32>
    %c41 = arith.constant 41 : index
    %179 = memref.load %arg1[%c41] : memref<81xf32, #tpu.memory_space<smem>>
    %180 = vector.broadcast %179 : f32 to vector<8x512xf32>
    %181 = arith.mulf %55, %180 : vector<8x512xf32>
    %182 = arith.addf %178, %181 : vector<8x512xf32>
    %c42 = arith.constant 42 : index
    %183 = memref.load %arg1[%c42] : memref<81xf32, #tpu.memory_space<smem>>
    %184 = vector.broadcast %183 : f32 to vector<8x512xf32>
    %185 = arith.mulf %75, %184 : vector<8x512xf32>
    %186 = arith.addf %182, %185 : vector<8x512xf32>
    %c43 = arith.constant 43 : index
    %187 = memref.load %arg1[%c43] : memref<81xf32, #tpu.memory_space<smem>>
    %188 = vector.broadcast %187 : f32 to vector<8x512xf32>
    %189 = arith.mulf %95, %188 : vector<8x512xf32>
    %190 = arith.addf %186, %189 : vector<8x512xf32>
    %c44 = arith.constant 44 : index
    %191 = memref.load %arg1[%c44] : memref<81xf32, #tpu.memory_space<smem>>
    %192 = vector.broadcast %191 : f32 to vector<8x512xf32>
    %193 = arith.mulf %115, %192 : vector<8x512xf32>
    %194 = arith.addf %190, %193 : vector<8x512xf32>
    %c45 = arith.constant 45 : index
    %195 = memref.load %arg1[%c45] : memref<81xf32, #tpu.memory_space<smem>>
    %196 = vector.broadcast %195 : f32 to vector<8x512xf32>
    %197 = arith.mulf %135, %196 : vector<8x512xf32>
    %198 = arith.addf %194, %197 : vector<8x512xf32>
    %c46 = arith.constant 46 : index
    %199 = memref.load %arg1[%c46] : memref<81xf32, #tpu.memory_space<smem>>
    %200 = vector.broadcast %199 : f32 to vector<8x512xf32>
    %201 = arith.mulf %155, %200 : vector<8x512xf32>
    %202 = arith.addf %198, %201 : vector<8x512xf32>
    %c47 = arith.constant 47 : index
    %203 = memref.load %arg1[%c47] : memref<81xf32, #tpu.memory_space<smem>>
    %204 = vector.broadcast %203 : f32 to vector<8x512xf32>
    %205 = arith.mulf %175, %204 : vector<8x512xf32>
    %206 = arith.addf %202, %205 : vector<8x512xf32>
    %c72 = arith.constant 72 : index
    %207 = memref.load %arg1[%c72] : memref<81xf32, #tpu.memory_space<smem>>
    %208 = vector.broadcast %207 : f32 to vector<8x512xf32>
    %209 = arith.addf %206, %208 : vector<8x512xf32>
    %cst_16 = arith.constant 0.000000e+00 : f32
    %210 = vector.broadcast %cst_16 : f32 to vector<8x512xf32>
    %211 = arith.maximumf %209, %210 : vector<8x512xf32>
    %c48 = arith.constant 48 : index
    %212 = memref.load %arg1[%c48] : memref<81xf32, #tpu.memory_space<smem>>
    %213 = vector.broadcast %212 : f32 to vector<8x512xf32>
    %214 = arith.mulf %35, %213 : vector<8x512xf32>
    %c49 = arith.constant 49 : index
    %215 = memref.load %arg1[%c49] : memref<81xf32, #tpu.memory_space<smem>>
    %216 = vector.broadcast %215 : f32 to vector<8x512xf32>
    %217 = arith.mulf %55, %216 : vector<8x512xf32>
    %218 = arith.addf %214, %217 : vector<8x512xf32>
    %c50 = arith.constant 50 : index
    %219 = memref.load %arg1[%c50] : memref<81xf32, #tpu.memory_space<smem>>
    %220 = vector.broadcast %219 : f32 to vector<8x512xf32>
    %221 = arith.mulf %75, %220 : vector<8x512xf32>
    %222 = arith.addf %218, %221 : vector<8x512xf32>
    %c51 = arith.constant 51 : index
    %223 = memref.load %arg1[%c51] : memref<81xf32, #tpu.memory_space<smem>>
    %224 = vector.broadcast %223 : f32 to vector<8x512xf32>
    %225 = arith.mulf %95, %224 : vector<8x512xf32>
    %226 = arith.addf %222, %225 : vector<8x512xf32>
    %c52 = arith.constant 52 : index
    %227 = memref.load %arg1[%c52] : memref<81xf32, #tpu.memory_space<smem>>
    %228 = vector.broadcast %227 : f32 to vector<8x512xf32>
    %229 = arith.mulf %115, %228 : vector<8x512xf32>
    %230 = arith.addf %226, %229 : vector<8x512xf32>
    %c53 = arith.constant 53 : index
    %231 = memref.load %arg1[%c53] : memref<81xf32, #tpu.memory_space<smem>>
    %232 = vector.broadcast %231 : f32 to vector<8x512xf32>
    %233 = arith.mulf %135, %232 : vector<8x512xf32>
    %234 = arith.addf %230, %233 : vector<8x512xf32>
    %c54 = arith.constant 54 : index
    %235 = memref.load %arg1[%c54] : memref<81xf32, #tpu.memory_space<smem>>
    %236 = vector.broadcast %235 : f32 to vector<8x512xf32>
    %237 = arith.mulf %155, %236 : vector<8x512xf32>
    %238 = arith.addf %234, %237 : vector<8x512xf32>
    %c55 = arith.constant 55 : index
    %239 = memref.load %arg1[%c55] : memref<81xf32, #tpu.memory_space<smem>>
    %240 = vector.broadcast %239 : f32 to vector<8x512xf32>
    %241 = arith.mulf %175, %240 : vector<8x512xf32>
    %242 = arith.addf %238, %241 : vector<8x512xf32>
    %c73 = arith.constant 73 : index
    %243 = memref.load %arg1[%c73] : memref<81xf32, #tpu.memory_space<smem>>
    %244 = vector.broadcast %243 : f32 to vector<8x512xf32>
    %245 = arith.addf %242, %244 : vector<8x512xf32>
    %cst_17 = arith.constant 0.000000e+00 : f32
    %246 = vector.broadcast %cst_17 : f32 to vector<8x512xf32>
    %247 = arith.maximumf %245, %246 : vector<8x512xf32>
    %c56 = arith.constant 56 : index
    %248 = memref.load %arg1[%c56] : memref<81xf32, #tpu.memory_space<smem>>
    %249 = vector.broadcast %248 : f32 to vector<8x512xf32>
    %250 = arith.mulf %35, %249 : vector<8x512xf32>
    %c57 = arith.constant 57 : index
    %251 = memref.load %arg1[%c57] : memref<81xf32, #tpu.memory_space<smem>>
    %252 = vector.broadcast %251 : f32 to vector<8x512xf32>
    %253 = arith.mulf %55, %252 : vector<8x512xf32>
    %254 = arith.addf %250, %253 : vector<8x512xf32>
    %c58 = arith.constant 58 : index
    %255 = memref.load %arg1[%c58] : memref<81xf32, #tpu.memory_space<smem>>
    %256 = vector.broadcast %255 : f32 to vector<8x512xf32>
    %257 = arith.mulf %75, %256 : vector<8x512xf32>
    %258 = arith.addf %254, %257 : vector<8x512xf32>
    %c59 = arith.constant 59 : index
    %259 = memref.load %arg1[%c59] : memref<81xf32, #tpu.memory_space<smem>>
    %260 = vector.broadcast %259 : f32 to vector<8x512xf32>
    %261 = arith.mulf %95, %260 : vector<8x512xf32>
    %262 = arith.addf %258, %261 : vector<8x512xf32>
    %c60 = arith.constant 60 : index
    %263 = memref.load %arg1[%c60] : memref<81xf32, #tpu.memory_space<smem>>
    %264 = vector.broadcast %263 : f32 to vector<8x512xf32>
    %265 = arith.mulf %115, %264 : vector<8x512xf32>
    %266 = arith.addf %262, %265 : vector<8x512xf32>
    %c61 = arith.constant 61 : index
    %267 = memref.load %arg1[%c61] : memref<81xf32, #tpu.memory_space<smem>>
    %268 = vector.broadcast %267 : f32 to vector<8x512xf32>
    %269 = arith.mulf %135, %268 : vector<8x512xf32>
    %270 = arith.addf %266, %269 : vector<8x512xf32>
    %c62 = arith.constant 62 : index
    %271 = memref.load %arg1[%c62] : memref<81xf32, #tpu.memory_space<smem>>
    %272 = vector.broadcast %271 : f32 to vector<8x512xf32>
    %273 = arith.mulf %155, %272 : vector<8x512xf32>
    %274 = arith.addf %270, %273 : vector<8x512xf32>
    %c63 = arith.constant 63 : index
    %275 = memref.load %arg1[%c63] : memref<81xf32, #tpu.memory_space<smem>>
    %276 = vector.broadcast %275 : f32 to vector<8x512xf32>
    %277 = arith.mulf %175, %276 : vector<8x512xf32>
    %278 = arith.addf %274, %277 : vector<8x512xf32>
    %c74 = arith.constant 74 : index
    %279 = memref.load %arg1[%c74] : memref<81xf32, #tpu.memory_space<smem>>
    %280 = vector.broadcast %279 : f32 to vector<8x512xf32>
    %281 = arith.addf %278, %280 : vector<8x512xf32>
    %cst_18 = arith.constant 0.000000e+00 : f32
    %282 = vector.broadcast %cst_18 : f32 to vector<8x512xf32>
    %283 = arith.maximumf %281, %282 : vector<8x512xf32>
    %c64 = arith.constant 64 : index
    %284 = memref.load %arg1[%c64] : memref<81xf32, #tpu.memory_space<smem>>
    %285 = vector.broadcast %284 : f32 to vector<8x512xf32>
    %286 = arith.mulf %35, %285 : vector<8x512xf32>
    %c65 = arith.constant 65 : index
    %287 = memref.load %arg1[%c65] : memref<81xf32, #tpu.memory_space<smem>>
    %288 = vector.broadcast %287 : f32 to vector<8x512xf32>
    %289 = arith.mulf %55, %288 : vector<8x512xf32>
    %290 = arith.addf %286, %289 : vector<8x512xf32>
    %c66 = arith.constant 66 : index
    %291 = memref.load %arg1[%c66] : memref<81xf32, #tpu.memory_space<smem>>
    %292 = vector.broadcast %291 : f32 to vector<8x512xf32>
    %293 = arith.mulf %75, %292 : vector<8x512xf32>
    %294 = arith.addf %290, %293 : vector<8x512xf32>
    %c67 = arith.constant 67 : index
    %295 = memref.load %arg1[%c67] : memref<81xf32, #tpu.memory_space<smem>>
    %296 = vector.broadcast %295 : f32 to vector<8x512xf32>
    %297 = arith.mulf %95, %296 : vector<8x512xf32>
    %298 = arith.addf %294, %297 : vector<8x512xf32>
    %c68 = arith.constant 68 : index
    %299 = memref.load %arg1[%c68] : memref<81xf32, #tpu.memory_space<smem>>
    %300 = vector.broadcast %299 : f32 to vector<8x512xf32>
    %301 = arith.mulf %115, %300 : vector<8x512xf32>
    %302 = arith.addf %298, %301 : vector<8x512xf32>
    %c69 = arith.constant 69 : index
    %303 = memref.load %arg1[%c69] : memref<81xf32, #tpu.memory_space<smem>>
    %304 = vector.broadcast %303 : f32 to vector<8x512xf32>
    %305 = arith.mulf %135, %304 : vector<8x512xf32>
    %306 = arith.addf %302, %305 : vector<8x512xf32>
    %c70 = arith.constant 70 : index
    %307 = memref.load %arg1[%c70] : memref<81xf32, #tpu.memory_space<smem>>
    %308 = vector.broadcast %307 : f32 to vector<8x512xf32>
    %309 = arith.mulf %155, %308 : vector<8x512xf32>
    %310 = arith.addf %306, %309 : vector<8x512xf32>
    %c71 = arith.constant 71 : index
    %311 = memref.load %arg1[%c71] : memref<81xf32, #tpu.memory_space<smem>>
    %312 = vector.broadcast %311 : f32 to vector<8x512xf32>
    %313 = arith.mulf %175, %312 : vector<8x512xf32>
    %314 = arith.addf %310, %313 : vector<8x512xf32>
    %c75 = arith.constant 75 : index
    %315 = memref.load %arg1[%c75] : memref<81xf32, #tpu.memory_space<smem>>
    %316 = vector.broadcast %315 : f32 to vector<8x512xf32>
    %317 = arith.addf %314, %316 : vector<8x512xf32>
    %cst_19 = arith.constant 0.000000e+00 : f32
    %318 = vector.broadcast %cst_19 : f32 to vector<8x512xf32>
    %319 = arith.maximumf %317, %318 : vector<8x512xf32>
    %c76 = arith.constant 76 : index
    %320 = memref.load %arg1[%c76] : memref<81xf32, #tpu.memory_space<smem>>
    %321 = vector.broadcast %320 : f32 to vector<8x512xf32>
    %322 = arith.mulf %211, %321 : vector<8x512xf32>
    %c77 = arith.constant 77 : index
    %323 = memref.load %arg1[%c77] : memref<81xf32, #tpu.memory_space<smem>>
    %324 = vector.broadcast %323 : f32 to vector<8x512xf32>
    %325 = arith.mulf %247, %324 : vector<8x512xf32>
    %326 = arith.addf %322, %325 : vector<8x512xf32>
    %c78 = arith.constant 78 : index
    %327 = memref.load %arg1[%c78] : memref<81xf32, #tpu.memory_space<smem>>
    %328 = vector.broadcast %327 : f32 to vector<8x512xf32>
    %329 = arith.mulf %283, %328 : vector<8x512xf32>
    %330 = arith.addf %326, %329 : vector<8x512xf32>
    %c79 = arith.constant 79 : index
    %331 = memref.load %arg1[%c79] : memref<81xf32, #tpu.memory_space<smem>>
    %332 = vector.broadcast %331 : f32 to vector<8x512xf32>
    %333 = arith.mulf %319, %332 : vector<8x512xf32>
    %334 = arith.addf %330, %333 : vector<8x512xf32>
    %c80 = arith.constant 80 : index
    %335 = memref.load %arg1[%c80] : memref<81xf32, #tpu.memory_space<smem>>
    %336 = vector.broadcast %335 : f32 to vector<8x512xf32>
    %337 = arith.addf %334, %336 : vector<8x512xf32>
    %c0_20 = arith.constant 0 : index
    %338 = arith.index_cast %3 : i32 to index
    %339 = vector.load %arg3[%c0_20, %338] : memref<8x512xf32, #tpu.memory_space<vmem>>, vector<8x512xf32>
    tpu.vector_store %arg3[%c0_20, %338], %337 {strides = array<i32>} : memref<8x512xf32, #tpu.memory_space<vmem>>, vector<8x512xf32>,
    %c1_i32_21 = arith.constant 1 : i32
    return
  }
  func.func @transform_0(%arg0: i32) -> i32 {
    %c0_i32 = arith.constant 0 : i32
    %c0_i32_0 = arith.constant 0 : i32
    return %c0_i32 : i32
  }
  func.func @transform_1(%arg0: i32) -> (i32, i32, i32) {
    %c0_i32 = arith.constant 0 : i32
    %c0_i32_0 = arith.constant 0 : i32
    %c0_i32_1 = arith.constant 0 : i32
    return %c0_i32, %c0_i32_0, %arg0 : i32, i32, i32
  }
  func.func @transform_2(%arg0: i32) -> (i32, i32) {
    %c0_i32 = arith.constant 0 : i32
    %c0_i32_0 = arith.constant 0 : i32
    return %c0_i32, %arg0 : i32, i32
  }
}

</mosaic_0001>

<bundles_post_ra>
// kernel: superpoint_score_forward.1
= control target key start
LH: loop header
LB: loop body
LE: loop exit
PB: predicated region body
PF: predicated region fallthrough
CT: control target
= control target key end

     0   :  { %7 = vsyncpa [#allocation3], 0  ;;  %s1641_s0 = inlined_call_operand.vmem [shape: f32[81], index: 0, kind: input, shape index: {}]   ;;  %s1642_s1 = inlined_call_operand.vmem [shape: f32[4,8,512], index: 1, kind: input, shape index: {}]   ;;  %s1643_s2 = inlined_call_operand.vmem [shape: f32[8,512], index: 2, kind: output, shape index: {}]  }
   0x1   :  { %s14_s11 = sshll.u32 %s1641_s0, 4  ;;  %s15_s11 = int_to_ptr.vmem [resolvable:$true] %s14_s11 }
   0x2   :  { %s908_s12 = scalar_lea.vmem %s15_s11, 16  ;;  %p913_p1 = scmp.lt.s32.totalorder %s15_s11, %s15_s11 }
   0x3   :  { %p909_p0 = scmp.ne.s32.totalorder %s15_s11, %s908_s12  ;;  %p914_p2 = scmp.lt.s32.totalorder %s908_s12, %s908_s12 }
   0x5   :  { %p915_p3 = por %p914_p2, %p913_p1 }
   0x7   :  { %p916_p4 = pnand %p915_p3, %p909_p0 }
   0x9   :  { %919 = shalt.err (!%p916_p4)
}
   0xa   :  { %s922_s13 = smov [#allocation2]  }
   0xb   :  { %17 = dma.vmem_to_smem %s15_s11, 16, %s922_s13, [#allocation3]  }
   0xc   :  { %920 = dma.done.wait [#allocation3], 16  }
   0xd   :  { %921 = vsyncadd [#allocation3], 4294967280 }
   0xe   :  { %23 = sfence }
   0xf   :  { %s49_s14 = sld [smem:[#allocation2]]  ;;  %s827_s15 = sld [smem:[#allocation2 + $0x1]]  ;;  %v944_v0 = vld [vmem:[%s1642_s1] sm:$0xff]  ;;  %v949_v1 = vld [vmem:[%s1642_s1 + $0x8] sm:$0xff]  ;;  %v954_v2 = vld [vmem:[%s1642_s1 + $0x10] sm:$0xff] }
  0x10   :  { %s828_s16 = sld [smem:[#allocation2 + $0x2]]  ;;  %v959_v3 = vld [vmem:[%s1642_s1 + $0x18] sm:$0xff]  ;;  %s961_s24 = sld [smem:[#allocation2 + $0x3]]  ;;  %v968_v4 = vld [vmem:[%s1642_s1 + $0x20] sm:$0xff]  ;;  %v973_v5 = vld [vmem:[%s1642_s1 + $0x28] sm:$0xff] }
  0x11   :  { %s963_s25 = sld [smem:[#allocation2 + $0x20]]  ;;  %s975_s30 = sld [smem:[#allocation2 + $0x4]]  ;;  %v982_v6 = vld [vmem:[%s1642_s1 + $0x30] sm:$0xff]  ;;  %v987_v7 = vld [vmem:[%s1642_s1 + $0x38] sm:$0xff]  ;;  %v992_v8 = vld [vmem:[%s1642_s1 + $0x40] sm:$0xff] }
  0x12   :  { %s977_s3 = sld [smem:[#allocation2 + $0x5]]  ;;  %v997_v10 = vld [vmem:[%s1642_s1 + $0x48] sm:$0xff]  ;;  %v1002_v11 = vld [vmem:[%s1642_s1 + $0x50] sm:$0xff]  ;;  %v1007_v12 = vld [vmem:[%s1642_s1 + $0x58] sm:$0xff]  ;;  %s1045_s23 = sld [smem:[#allocation2 + $0x6]] }
  0x13   :  { %v1020_v23 = vld [vmem:[%s1642_s1 + $0x60] sm:$0xff]  ;;  %v1029_v28 = vld [vmem:[%s1642_s1 + $0x68] sm:$0xff]  ;;  %v1034_v29 = vld [vmem:[%s1642_s1 + $0x70] sm:$0xff]  ;;  %s1047_s26 = sld [smem:[#allocation2 + $0x7]]  ;;  %s1049_s27 = sld [smem:[#allocation2 + $0x21]] }
  0x14   :  { %v1039_v30 = vld [vmem:[%s1642_s1 + $0x78] sm:$0xff]  ;;  %s1051_s1 = sld [smem:[#allocation2 + $0x8]]  ;;  %s1069_s28 = sld [smem:[#allocation2 + $0xb]] }
  0x15   :  { %v50_v9 = vstv %s49_s14  ;;  %v56_v17 = vstv %s827_s15  ;;  %s1071_s29 = sld [smem:[#allocation2 + $0x22]]  ;;  %s1105_s4 = sld [smem:[#allocation2 + $0xe]] }
  0x16   :  { %v51_v13 = vmul.f32 %v50_v9, %v944_v0  ;;  %v52_v14 = vmul.f32 %v50_v9, %v949_v1  ;;  %v53_v15 = vmul.f32 %v50_v9, %v954_v2  ;;  %v54_v16 = vmul.f32 %v50_v9, %v959_v3  ;;  %s1107_s5 = sld [smem:[#allocation2 + $0xf]]  ;;  %s1133_s6 = sld [smem:[#allocation2 + $0x23]] }
  0x17   :  { %v66_v18 = vstv %s828_s16  ;;  %v57_v19 = vmul.f32 %v968_v4, %v56_v17  ;;  %v58_v20 = vmul.f32 %v973_v5, %v56_v17  ;;  %v59_v21 = vmul.f32 %v982_v6, %v56_v17  ;;  %s1135_s7 = sld [smem:[#allocation2 + $0x10]]  ;;  %s1141_s8 = sld [smem:[#allocation2 + $0x11]] }
  0x18   :  { %v60_v22 = vmul.f32 %v987_v7, %v56_v17  ;;  %v67_v24 = vmul.f32 %v992_v8, %v66_v18  ;;  %v68_v25 = vmul.f32 %v997_v10, %v66_v18  ;;  %v69_v26 = vmul.f32 %v1002_v11, %v66_v18  ;;  %s1143_s9 = sld [smem:[#allocation2 + $0x12]]  ;;  %s1165_s10 = sld [smem:[#allocation2 + $0x13]] }
  0x19   :  { %v70_v27 = vmul.f32 %v1007_v12, %v66_v18  ;;  %v61_v31 = vadd.f32 %v57_v19, %v51_v13  ;;  %v62_v32 = vadd.f32 %v58_v20, %v52_v14  ;;  %v63_v33 = vadd.f32 %v59_v21, %v53_v15  ;;  %s1167_s11 = sld [smem:[#allocation2 + $0x24]]  ;;  %s1175_s13 = sld [smem:[#allocation2 + $0x15]] }
  0x1a   :  { %v64_v34 = vadd.f32 %v60_v22, %v54_v16  ;;  %v76_v35 = vstv %s961_s24  ;;  %v86_v36 = vstv %s963_s25  ;;  %v96_v37 = vstv %s975_s30  ;;  %s1065_s24 = sld [smem:[#allocation2 + $0x9]]  ;;  %s1067_s25 = sld [smem:[#allocation2 + $0xa]] }
  0x1b   :  { %v102_v38 = vstv %s977_s3  ;;  %v71_v39 = vadd.f32 %v67_v24, %v61_v31  ;;  %v72_v40 = vadd.f32 %v68_v25, %v62_v32  ;;  %v73_v41 = vadd.f32 %v69_v26, %v63_v33  ;;  %s1097_s30 = sld [smem:[#allocation2 + $0xc]]  ;;  %s1099_s3 = sld [smem:[#allocation2 + $0xd]] }
  0x1c   :  { %v74_v42 = vadd.f32 %v70_v27, %v64_v34  ;;  %v77_v43 = vmul.f32 %v1020_v23, %v76_v35  ;;  %v78_v44 = vmul.f32 %v1029_v28, %v76_v35  ;;  %v79_v45 = vmul.f32 %v1034_v29, %v76_v35  ;;  %s1173_s12 = sld [smem:[#allocation2 + $0x14]]  ;;  %s1201_s17 = sld [smem:[#allocation2 + $0x16]] }
  0x1d   :  { %v80_v46 = vmul.f32 %v1039_v30, %v76_v35  ;;  %v97_v47 = vmul.f32 %v96_v37, %v944_v0  ;;  %v98_v48 = vmul.f32 %v96_v37, %v949_v1  ;;  %v99_v49 = vmul.f32 %v96_v37, %v954_v2  ;;  %s1203_s18 = sld [smem:[#allocation2 + $0x17]]  ;;  %s1205_s14 = sld [smem:[#allocation2 + $0x25]] }
  0x1e   :  { %v100_v50 = vmul.f32 %v96_v37, %v959_v3  ;;  %v81_v51 = vadd.f32 %v77_v43, %v71_v39  ;;  %v82_v52 = vadd.f32 %v78_v44, %v72_v40  ;;  %v83_v53 = vadd.f32 %v79_v45, %v73_v41  ;;  %s1207_s0 = sld [smem:[#allocation2 + $0x18]]  ;;  %s1221_s15 = sld [smem:[#allocation2 + $0x19]] }
  0x1f   :  { %v84_v54 = vadd.f32 %v80_v46, %v74_v42  ;;  %v103_v55 = vmul.f32 %v968_v4, %v102_v38  ;;  %v104_v56 = vmul.f32 %v973_v5, %v102_v38  ;;  %v105_v57 = vmul.f32 %v982_v6, %v102_v38  ;;  %s1223_s16 = sld [smem:[#allocation2 + $0x1a]]  ;;  %s1225_s19 = sld [smem:[#allocation2 + $0x1b]] }
  0x20   :  { %v106_v58 = vmul.f32 %v987_v7, %v102_v38  ;;  %v87_v59 = vadd.f32 %v86_v36, %v81_v51  ;;  %v88_v60 = vadd.f32 %v86_v36, %v82_v52  ;;  %v89_v61 = vadd.f32 %v86_v36, %v83_v53  ;;  %s1227_s20 = sld [smem:[#allocation2 + $0x26]]  ;;  %s1253_s21 = sld [smem:[#allocation2 + $0x1c]] }
  0x21   :  { %v90_v62 = vadd.f32 %v86_v36, %v84_v54  ;;  %v107_v63 = vadd.f32 %v103_v55, %v97_v47  ;;  %v108_v9 = vadd.f32 %v104_v56, %v98_v48  ;;  %v109_v13 = vadd.f32 %v105_v57, %v99_v49  ;;  %s1255_s22 = sld [smem:[#allocation2 + $0x1d]] }
  0x22   :  { %v110_v14 = vadd.f32 %v106_v58, %v100_v50  ;;  %v1073_v15 = vmax.f32 %v87_v59, 0.0  ;;  %v1075_v16 = vmax.f32 %v88_v60, 0.0  ;;  %v1077_v17 = vmax.f32 %v89_v61, 0.0 }
  0x23   :  { %v1079_v18 = vmax.f32 %v90_v62, 0.0  ;;  %v112_v19 = vstv %s1045_s23  ;;  %v122_v20 = vstv %s1047_s26  ;;  %v132_v21 = vstv %s1049_s27  ;;  %s1261_s23 = sld [smem:[#allocation2 + $0x1e]]  ;;  %s1263_s26 = sld [smem:[#allocation2 + $0x1f]] }
  0x24   :  { %v142_v22 = vstv %s1051_s1  ;;  %v113_v24 = vmul.f32 %v992_v8, %v112_v19  ;;  %v114_v25 = vmul.f32 %v997_v10, %v112_v19  ;;  %v115_v26 = vmul.f32 %v1002_v11, %v112_v19  ;;  %s1289_s27 = sld [smem:[#allocation2 + $0x27]]  ;;  %s1291_s1 = sld [smem:[#allocation2 + $0x28]] }
  0x25   :  { %v116_v27 = vmul.f32 %v1007_v12, %v112_v19  ;;  %v123_v31 = vmul.f32 %v1020_v23, %v122_v20  ;;  %v124_v32 = vmul.f32 %v1029_v28, %v122_v20  ;;  %v125_v33 = vmul.f32 %v1034_v29, %v122_v20 }
  0x26   :  { %v126_v34 = vmul.f32 %v1039_v30, %v122_v20  ;;  %v117_v35 = vadd.f32 %v113_v24, %v107_v63  ;;  %v118_v36 = vadd.f32 %v114_v25, %v108_v9  ;;  %v119_v37 = vadd.f32 %v115_v26, %v109_v13 }
  0x27   :  { %v120_v38 = vadd.f32 %v116_v27, %v110_v14  ;;  %v143_v39 = vmul.f32 %v142_v22, %v944_v0  ;;  %v144_v40 = vmul.f32 %v142_v22, %v949_v1  ;;  %v145_v41 = vmul.f32 %v142_v22, %v954_v2 }
  0x28   :  { %v146_v42 = vmul.f32 %v142_v22, %v959_v3  ;;  %v127_v43 = vadd.f32 %v123_v31, %v117_v35  ;;  %v128_v44 = vadd.f32 %v124_v32, %v118_v36  ;;  %v129_v45 = vadd.f32 %v125_v33, %v119_v37 }
  0x29   :  { %v130_v46 = vadd.f32 %v126_v34, %v120_v38  ;;  %v148_v47 = vstv %s1065_s24  ;;  %v158_v48 = vstv %s1067_s25  ;;  %v168_v49 = vstv %s1069_s28  ;;  %s1297_s24 = sld [smem:[#allocation2 + $0x29]]  ;;  %s1299_s25 = sld [smem:[#allocation2 + $0x2a]] }
  0x2a   :  { %v178_v50 = vstv %s1071_s29  ;;  %v133_v51 = vadd.f32 %v132_v21, %v127_v43  ;;  %v134_v52 = vadd.f32 %v132_v21, %v128_v44  ;;  %v135_v53 = vadd.f32 %v132_v21, %v129_v45  ;;  %s1321_s28 = sld [smem:[#allocation2 + $0x2b]]  ;;  %s1323_s29 = sld [smem:[#allocation2 + $0x2c]] }
  0x2b   :  { %v136_v54 = vadd.f32 %v132_v21, %v130_v46  ;;  %v149_v55 = vmul.f32 %v968_v4, %v148_v47  ;;  %v150_v56 = vmul.f32 %v973_v5, %v148_v47  ;;  %v151_v57 = vmul.f32 %v982_v6, %v148_v47 }
  0x2c   :  { %v152_v58 = vmul.f32 %v987_v7, %v148_v47  ;;  %v1113_v59 = vmax.f32 %v133_v51, 0.0  ;;  %v1115_v60 = vmax.f32 %v134_v52, 0.0  ;;  %v1117_v61 = vmax.f32 %v135_v53, 0.0 }
  0x2d   :  { %v1119_v62 = vmax.f32 %v136_v54, 0.0  ;;  %v153_v63 = vadd.f32 %v149_v55, %v143_v39  ;;  %v154_v9 = vadd.f32 %v150_v56, %v144_v40  ;;  %v155_v13 = vadd.f32 %v151_v57, %v145_v41 }
  0x2e   :  { %v156_v14 = vadd.f32 %v152_v58, %v146_v42  ;;  %v159_v19 = vmul.f32 %v992_v8, %v158_v48  ;;  %v160_v20 = vmul.f32 %v997_v10, %v158_v48  ;;  %v161_v21 = vmul.f32 %v1002_v11, %v158_v48 }
  0x2f   :  { %v162_v22 = vmul.f32 %v1007_v12, %v158_v48  ;;  %v169_v24 = vmul.f32 %v1020_v23, %v168_v49  ;;  %v170_v25 = vmul.f32 %v1029_v28, %v168_v49  ;;  %v171_v26 = vmul.f32 %v1034_v29, %v168_v49 }
  0x30   :  { %v172_v27 = vmul.f32 %v1039_v30, %v168_v49  ;;  %v163_v31 = vadd.f32 %v159_v19, %v153_v63  ;;  %v164_v32 = vadd.f32 %v160_v20, %v154_v9  ;;  %v165_v33 = vadd.f32 %v161_v21, %v155_v13 }
  0x31   :  { %v166_v34 = vadd.f32 %v162_v22, %v156_v14  ;;  %v188_v35 = vstv %s1097_s30  ;;  %v194_v36 = vstv %s1099_s3  ;;  %v204_v37 = vstv %s1105_s4  ;;  %s1329_s30 = sld [smem:[#allocation2 + $0x2d]]  ;;  %s1331_s3 = sld [smem:[#allocation2 + $0x2e]] }
  0x32   :  { %v214_v38 = vstv %s1107_s5  ;;  %v173_v39 = vadd.f32 %v169_v24, %v163_v31  ;;  %v174_v40 = vadd.f32 %v170_v25, %v164_v32  ;;  %v175_v41 = vadd.f32 %v171_v26, %v165_v33  ;;  %s1357_s4 = sld [smem:[#allocation2 + $0x2f]]  ;;  %s1359_s5 = sld [smem:[#allocation2 + $0x48]] }
  0x33   :  { %v176_v42 = vadd.f32 %v172_v27, %v166_v34  ;;  %v189_v43 = vmul.f32 %v188_v35, %v944_v0  ;;  %v190_v44 = vmul.f32 %v188_v35, %v949_v1  ;;  %v191_v45 = vmul.f32 %v188_v35, %v954_v2 }
  0x34   :  { %v192_v46 = vmul.f32 %v188_v35, %v959_v3  ;;  %v179_v47 = vadd.f32 %v178_v50, %v173_v39  ;;  %v180_v48 = vadd.f32 %v178_v50, %v174_v40  ;;  %v181_v49 = vadd.f32 %v178_v50, %v175_v41 }
  0x35   :  { %v182_v51 = vadd.f32 %v178_v50, %v176_v42  ;;  %v195_v52 = vmul.f32 %v968_v4, %v194_v36  ;;  %v196_v53 = vmul.f32 %v973_v5, %v194_v36  ;;  %v197_v54 = vmul.f32 %v982_v6, %v194_v36 }
  0x36   :  { %v198_v55 = vmul.f32 %v987_v7, %v194_v36  ;;  %v1149_v56 = vmax.f32 %v179_v47, 0.0  ;;  %v1151_v57 = vmax.f32 %v180_v48, 0.0  ;;  %v1153_v58 = vmax.f32 %v181_v49, 0.0 }
  0x37   :  { %v1155_v63 = vmax.f32 %v182_v51, 0.0  ;;  %v199_v9 = vadd.f32 %v195_v52, %v189_v43  ;;  %v200_v13 = vadd.f32 %v196_v53, %v190_v44  ;;  %v201_v14 = vadd.f32 %v197_v54, %v191_v45 }
  0x38   :  { %v202_v50 = vadd.f32 %v198_v55, %v192_v46  ;;  %v205_v19 = vmul.f32 %v992_v8, %v204_v37  ;;  %v206_v20 = vmul.f32 %v997_v10, %v204_v37  ;;  %v207_v21 = vmul.f32 %v1002_v11, %v204_v37 }
  0x39   :  { %v208_v22 = vmul.f32 %v1007_v12, %v204_v37  ;;  %v215_v24 = vmul.f32 %v1020_v23, %v214_v38  ;;  %v216_v25 = vmul.f32 %v1029_v28, %v214_v38  ;;  %v217_v26 = vmul.f32 %v1034_v29, %v214_v38 }
  0x3a   :  { %v218_v27 = vmul.f32 %v1039_v30, %v214_v38  ;;  %v209_v31 = vadd.f32 %v205_v19, %v199_v9  ;;  %v210_v32 = vadd.f32 %v206_v20, %v200_v13  ;;  %v211_v33 = vadd.f32 %v207_v21, %v201_v14 }
  0x3b   :  { %v212_v34 = vadd.f32 %v208_v22, %v202_v50  ;;  %v224_v35 = vstv %s1133_s6  ;;  %v234_v36 = vstv %s1135_s7  ;;  %v240_v39 = vstv %s1141_s8  ;;  %s1361_s6 = sld [smem:[#allocation2 + $0x30]]  ;;  %s1363_s7 = sld [smem:[#allocation2 + $0x31]] }
  0x3c   :  { %v250_v37 = vstv %s1143_s9  ;;  %v219_v40 = vadd.f32 %v215_v24, %v209_v31  ;;  %v220_v41 = vadd.f32 %v216_v25, %v210_v32  ;;  %v221_v42 = vadd.f32 %v217_v26, %v211_v33  ;;  %s1385_s8 = sld [smem:[#allocation2 + $0x32]]  ;;  %s1387_s9 = sld [smem:[#allocation2 + $0x33]] }
  0x3d   :  { %v222_v38 = vadd.f32 %v218_v27, %v212_v34  ;;  %v235_v43 = vmul.f32 %v234_v36, %v944_v0  ;;  %v236_v44 = vmul.f32 %v234_v36, %v949_v1  ;;  %v237_v45 = vmul.f32 %v234_v36, %v954_v2 }
  0x3e   :  { %v238_v46 = vmul.f32 %v234_v36, %v959_v3  ;;  %v225_v47 = vadd.f32 %v224_v35, %v219_v40  ;;  %v226_v48 = vadd.f32 %v224_v35, %v220_v41  ;;  %v227_v49 = vadd.f32 %v224_v35, %v221_v42 }
  0x3f   :  { %v228_v51 = vadd.f32 %v224_v35, %v222_v38  ;;  %v241_v52 = vmul.f32 %v968_v4, %v240_v39  ;;  %v242_v53 = vmul.f32 %v973_v5, %v240_v39  ;;  %v243_v54 = vmul.f32 %v982_v6, %v240_v39 }
  0x40   :  { %v244_v55 = vmul.f32 %v987_v7, %v240_v39  ;;  %v1185_v9 = vmax.f32 %v225_v47, 0.0  ;;  %v1187_v13 = vmax.f32 %v226_v48, 0.0  ;;  %v1189_v14 = vmax.f32 %v227_v49, 0.0 }
  0x41   :  { %v1191_v50 = vmax.f32 %v228_v51, 0.0  ;;  %v245_v19 = vadd.f32 %v241_v52, %v235_v43  ;;  %v246_v20 = vadd.f32 %v242_v53, %v236_v44  ;;  %v247_v21 = vadd.f32 %v243_v54, %v237_v45 }
  0x42   :  { %v248_v22 = vadd.f32 %v244_v55, %v238_v46  ;;  %v251_v24 = vmul.f32 %v992_v8, %v250_v37  ;;  %v252_v25 = vmul.f32 %v997_v10, %v250_v37  ;;  %v253_v26 = vmul.f32 %v1002_v11, %v250_v37 }
  0x43   :  { %v254_v27 = vmul.f32 %v1007_v12, %v250_v37  ;;  %v260_v31 = vstv %s1165_s10  ;;  %v270_v32 = vstv %s1167_s11  ;;  %v280_v33 = vstv %s1173_s12  ;;  %s1389_s10 = sld [smem:[#allocation2 + $0x34]]  ;;  %s1391_s11 = sld [smem:[#allocation2 + $0x35]] }
  0x44   :  { %v286_v34 = vstv %s1175_s13  ;;  %v255_v35 = vadd.f32 %v251_v24, %v245_v19  ;;  %v256_v36 = vadd.f32 %v252_v25, %v246_v20  ;;  %v257_v39 = vadd.f32 %v253_v26, %v247_v21  ;;  %s1413_s12 = sld [smem:[#allocation2 + $0x36]]  ;;  %s1419_s13 = sld [smem:[#allocation2 + $0x37]] }
  0x45   :  { %v258_v40 = vadd.f32 %v254_v27, %v248_v22  ;;  %v261_v41 = vmul.f32 %v1020_v23, %v260_v31  ;;  %v262_v37 = vmul.f32 %v1029_v28, %v260_v31  ;;  %v263_v42 = vmul.f32 %v1034_v29, %v260_v31 }
  0x46   :  { %v264_v38 = vmul.f32 %v1039_v30, %v260_v31  ;;  %v281_v43 = vmul.f32 %v280_v33, %v944_v0  ;;  %v282_v44 = vmul.f32 %v280_v33, %v949_v1  ;;  %v283_v45 = vmul.f32 %v280_v33, %v954_v2 }
  0x47   :  { %v284_v46 = vmul.f32 %v280_v33, %v959_v3  ;;  %v265_v47 = vadd.f32 %v261_v41, %v255_v35  ;;  %v266_v48 = vadd.f32 %v262_v37, %v256_v36  ;;  %v267_v49 = vadd.f32 %v263_v42, %v257_v39 }
  0x48   :  { %v268_v51 = vadd.f32 %v264_v38, %v258_v40  ;;  %v287_v52 = vmul.f32 %v968_v4, %v286_v34  ;;  %v288_v53 = vmul.f32 %v973_v5, %v286_v34  ;;  %v289_v54 = vmul.f32 %v982_v6, %v286_v34 }
  0x49   :  { %v290_v55 = vmul.f32 %v987_v7, %v286_v34  ;;  %v271_v19 = vadd.f32 %v270_v32, %v265_v47  ;;  %v272_v20 = vadd.f32 %v270_v32, %v266_v48  ;;  %v273_v21 = vadd.f32 %v270_v32, %v267_v49 }
  0x4a   :  { %v274_v22 = vadd.f32 %v270_v32, %v268_v51  ;;  %v291_v24 = vadd.f32 %v287_v52, %v281_v43  ;;  %v292_v25 = vadd.f32 %v288_v53, %v282_v44  ;;  %v293_v26 = vadd.f32 %v289_v54, %v283_v45 }
  0x4b   :  { %v294_v27 = vadd.f32 %v290_v55, %v284_v46  ;;  %v1229_v31 = vmax.f32 %v271_v19, 0.0  ;;  %v1231_v33 = vmax.f32 %v272_v20, 0.0  ;;  %v1233_v34 = vmax.f32 %v273_v21, 0.0 }
  0x4c   :  { %v1235_v32 = vmax.f32 %v274_v22, 0.0  ;;  %v296_v35 = vstv %s1201_s17  ;;  %v306_v36 = vstv %s1203_s18  ;;  %v316_v39 = vstv %s1205_s14  ;;  %s1425_s17 = sld [smem:[#allocation2 + $0x49]]  ;;  %s1427_s18 = sld [smem:[#allocation2 + $0x38]] }
  0x4d   :  { %v326_v40 = vstv %s1207_s0  ;;  %v297_v41 = vmul.f32 %v992_v8, %v296_v35  ;;  %v298_v37 = vmul.f32 %v997_v10, %v296_v35  ;;  %v299_v42 = vmul.f32 %v1002_v11, %v296_v35  ;;  %s1445_s14 = sld [smem:[#allocation2 + $0x39]]  ;;  %s1447_s0 = sld [smem:[#allocation2 + $0x3a]] }
  0x4e   :  { %v300_v38 = vmul.f32 %v1007_v12, %v296_v35  ;;  %v307_v43 = vmul.f32 %v1020_v23, %v306_v36  ;;  %v308_v44 = vmul.f32 %v1029_v28, %v306_v36  ;;  %v309_v45 = vmul.f32 %v1034_v29, %v306_v36 }
  0x4f   :  { %v310_v46 = vmul.f32 %v1039_v30, %v306_v36  ;;  %v301_v47 = vadd.f32 %v297_v41, %v291_v24  ;;  %v302_v48 = vadd.f32 %v298_v37, %v292_v25  ;;  %v303_v49 = vadd.f32 %v299_v42, %v293_v26 }
  0x50   :  { %v304_v51 = vadd.f32 %v300_v38, %v294_v27  ;;  %v327_v52 = vmul.f32 %v326_v40, %v944_v0  ;;  %v328_v53 = vmul.f32 %v326_v40, %v949_v1  ;;  %v329_v54 = vmul.f32 %v326_v40, %v954_v2 }
  0x51   :  { %v330_v55 = vmul.f32 %v326_v40, %v959_v3  ;;  %v311_v19 = vadd.f32 %v307_v43, %v301_v47  ;;  %v312_v20 = vadd.f32 %v308_v44, %v302_v48  ;;  %v313_v21 = vadd.f32 %v309_v45, %v303_v49 }
  0x52   :  { %v314_v22 = vadd.f32 %v310_v46, %v304_v51  ;;  %v332_v24 = vstv %s1221_s15  ;;  %v342_v25 = vstv %s1223_s16  ;;  %v352_v26 = vstv %s1225_s19  ;;  %s1449_s15 = sld [smem:[#allocation2 + $0x3b]]  ;;  %s1451_s16 = sld [smem:[#allocation2 + $0x3c]] }
  0x53   :  { %v362_v27 = vstv %s1227_s20  ;;  %v317_v35 = vadd.f32 %v316_v39, %v311_v19  ;;  %v318_v36 = vadd.f32 %v316_v39, %v312_v20  ;;  %v319_v41 = vadd.f32 %v316_v39, %v313_v21  ;;  %s1481_s19 = sld [smem:[#allocation2 + $0x3d]]  ;;  %s1483_s20 = sld [smem:[#allocation2 + $0x3e]] }
  0x54   :  { %v320_v40 = vadd.f32 %v316_v39, %v314_v22  ;;  %v333_v37 = vmul.f32 %v968_v4, %v332_v24  ;;  %v334_v42 = vmul.f32 %v973_v5, %v332_v24  ;;  %v335_v38 = vmul.f32 %v982_v6, %v332_v24 }
  0x55   :  { %v336_v43 = vmul.f32 %v987_v7, %v332_v24  ;;  %v1269_v44 = vmax.f32 %v317_v35, 0.0  ;;  %v1271_v45 = vmax.f32 %v318_v36, 0.0  ;;  %v1273_v46 = vmax.f32 %v319_v41, 0.0 }
  0x56   :  { %v1275_v47 = vmax.f32 %v320_v40, 0.0  ;;  %v337_v48 = vadd.f32 %v333_v37, %v327_v52  ;;  %v338_v49 = vadd.f32 %v334_v42, %v328_v53  ;;  %v339_v39 = vadd.f32 %v335_v38, %v329_v54 }
  0x57   :  { %1653 = vst [vmem:[#allocation5_spill] sm:$0xff] %v1271_v45  ;;  %1654 = vst [vmem:[#allocation6_spill] sm:$0xff] %v1273_v46  ;;  %v340_v51 = vadd.f32 %v336_v43, %v330_v55  ;;  %v343_v19 = vmul.f32 %v992_v8, %v342_v25  ;;  %v344_v20 = vmul.f32 %v997_v10, %v342_v25  ;;  %v372_v40 = vstv %s1253_s21  ;;  %s1489_s21 = sld [smem:[#allocation2 + $0x3f]] }
  0x58   :  { %1655 = vst [vmem:[#allocation7_spill] sm:$0xff] %v1275_v47  ;;  %v345_v21 = vmul.f32 %v1002_v11, %v342_v25  ;;  %v346_v22 = vmul.f32 %v1007_v12, %v342_v25  ;;  %v353_v24 = vmul.f32 %v1020_v23, %v352_v26  ;;  %v354_v35 = vmul.f32 %v1029_v28, %v352_v26 }
  0x59   :  { %v355_v52 = vmul.f32 %v1034_v29, %v352_v26  ;;  %v356_v53 = vmul.f32 %v1039_v30, %v352_v26  ;;  %v347_v54 = vadd.f32 %v343_v19, %v337_v48  ;;  %v348_v36 = vadd.f32 %v344_v20, %v338_v49 }
  0x5a   :  { %v349_v55 = vadd.f32 %v345_v21, %v339_v39  ;;  %v350_v41 = vadd.f32 %v346_v22, %v340_v51  ;;  %v378_v37 = vstv %s1255_s22  ;;  %v388_v42 = vstv %s1261_s23  ;;  %s1491_s22 = sld [smem:[#allocation2 + $0x4a]]  ;;  %s1509_s23 = sld [smem:[#allocation2 + $0x40]] }
  0x5b   :  { %v398_v38 = vstv %s1263_s26  ;;  %v357_v43 = vadd.f32 %v353_v24, %v347_v54  ;;  %v358_v47 = vadd.f32 %v354_v35, %v348_v36  ;;  %v373_v45 = vmul.f32 %v372_v40, %v944_v0  ;;  %s1511_s26 = sld [smem:[#allocation2 + $0x41]] }
  0x5c   :  { %v359_v46 = vadd.f32 %v355_v52, %v349_v55  ;;  %v360_v25 = vadd.f32 %v356_v53, %v350_v41  ;;  %v374_v26 = vmul.f32 %v372_v40, %v949_v1  ;;  %v375_v48 = vmul.f32 %v372_v40, %v954_v2 }
  0x5d   :  { %v376_v49 = vmul.f32 %v372_v40, %v959_v3  ;;  %v363_v39 = vadd.f32 %v362_v27, %v357_v43  ;;  %v364_v51 = vadd.f32 %v362_v27, %v358_v47  ;;  %v379_v21 = vmul.f32 %v968_v4, %v378_v37 }
  0x5e   :  { %v365_v19 = vadd.f32 %v362_v27, %v359_v46  ;;  %v366_v20 = vadd.f32 %v362_v27, %v360_v25  ;;  %v380_v22 = vmul.f32 %v973_v5, %v378_v37  ;;  %v381_v0 = vmul.f32 %v982_v6, %v378_v37 }
  0x5f   :  { %v382_v1 = vmul.f32 %v987_v7, %v378_v37  ;;  %v1305_v24 = vmax.f32 %v363_v39, 0.0  ;;  %v1307_v2 = vmax.f32 %v364_v51, 0.0  ;;  %v383_v52 = vadd.f32 %v379_v21, %v373_v45 }
  0x60   :  { %v1309_v3 = vmax.f32 %v365_v19, 0.0  ;;  %v1311_v35 = vmax.f32 %v366_v20, 0.0  ;;  %v384_v47 = vadd.f32 %v380_v22, %v374_v26  ;;  %v385_v46 = vadd.f32 %v381_v0, %v375_v48 }
  0x61   :  { %v386_v27 = vadd.f32 %v382_v1, %v376_v49  ;;  %v389_v4 = vmul.f32 %v992_v8, %v388_v42  ;;  %v390_v5 = vmul.f32 %v997_v10, %v388_v42  ;;  %v391_v6 = vmul.f32 %v1002_v11, %v388_v42 }
  0x62   :  { %v392_v7 = vmul.f32 %v1007_v12, %v388_v42  ;;  %v399_v53 = vmul.f32 %v1020_v23, %v398_v38  ;;  %v400_v54 = vmul.f32 %v1029_v28, %v398_v38  ;;  %v401_v45 = vmul.f32 %v1034_v29, %v398_v38 }
  0x63   :  { %v402_v36 = vmul.f32 %v1039_v30, %v398_v38  ;;  %v393_v55 = vadd.f32 %v389_v4, %v383_v52  ;;  %v394_v41 = vadd.f32 %v390_v5, %v384_v47  ;;  %v395_v40 = vadd.f32 %v391_v6, %v385_v46 }
  0x64   :  { %v396_v8 = vadd.f32 %v392_v7, %v386_v27  ;;  %v408_v10 = vstv %s1289_s27  ;;  %v418_v11 = vstv %s1291_s1  ;;  %v424_v37 = vstv %s1297_s24  ;;  %s1513_s27 = sld [smem:[#allocation2 + $0x42]]  ;;  %s1515_s1 = sld [smem:[#allocation2 + $0x43]] }
  0x65   :  { %v434_v12 = vstv %s1299_s25  ;;  %v403_v23 = vadd.f32 %v399_v53, %v393_v55  ;;  %v404_v28 = vadd.f32 %v400_v54, %v394_v41  ;;  %v405_v29 = vadd.f32 %v401_v45, %v395_v40  ;;  %s1537_s24 = sld [smem:[#allocation2 + $0x44]]  ;;  %s1539_s25 = sld [smem:[#allocation2 + $0x45]] }
  0x66   :  { %v406_v30 = vadd.f32 %v402_v36, %v396_v8  ;;  %v419_v42 = vmul.f32 %v418_v11, %v1073_v15  ;;  %v420_v38 = vmul.f32 %v418_v11, %v1075_v16  ;;  %v421_v43 = vmul.f32 %v418_v11, %v1077_v17 }
  0x67   :  { %v422_v25 = vmul.f32 %v418_v11, %v1079_v18  ;;  %v409_v26 = vadd.f32 %v408_v10, %v403_v23  ;;  %v410_v48 = vadd.f32 %v408_v10, %v404_v28  ;;  %v411_v49 = vadd.f32 %v408_v10, %v405_v29 }
  0x68   :  { %v412_v39 = vadd.f32 %v408_v10, %v406_v30  ;;  %v425_v51 = vmul.f32 %v424_v37, %v1113_v59  ;;  %v426_v19 = vmul.f32 %v424_v37, %v1115_v60  ;;  %v427_v20 = vmul.f32 %v424_v37, %v1117_v61 }
  0x69   :  { %v428_v21 = vmul.f32 %v424_v37, %v1119_v62  ;;  %v1341_v22 = vmax.f32 %v409_v26, 0.0  ;;  %v1343_v0 = vmax.f32 %v410_v48, 0.0  ;;  %v1345_v1 = vmax.f32 %v411_v49, 0.0  ;;  %v1656_v49 = vld [vmem:[#allocation5_spill] sm:$0xff] }
  0x6a   :  { %v1347_v52 = vmax.f32 %v412_v39, 0.0  ;;  %v429_v47 = vadd.f32 %v425_v51, %v419_v42  ;;  %v430_v46 = vadd.f32 %v426_v19, %v420_v38  ;;  %v431_v27 = vadd.f32 %v427_v20, %v421_v43  ;;  %v1657_v51 = vld [vmem:[#allocation6_spill] sm:$0xff]  ;;  %v1658_v20 = vld [vmem:[#allocation7_spill] sm:$0xff] }
  0x6b   :  { %v432_v4 = vadd.f32 %v428_v21, %v422_v25  ;;  %v435_v5 = vmul.f32 %v434_v12, %v1149_v56  ;;  %v436_v6 = vmul.f32 %v434_v12, %v1151_v57  ;;  %v437_v7 = vmul.f32 %v434_v12, %v1153_v58 }
  0x6c   :  { %v438_v53 = vmul.f32 %v434_v12, %v1155_v63  ;;  %v444_v54 = vstv %s1321_s28  ;;  %v454_v45 = vstv %s1323_s29  ;;  %v464_v36 = vstv %s1329_s30  ;;  %s1545_s28 = sld [smem:[#allocation2 + $0x46]]  ;;  %s1547_s29 = sld [smem:[#allocation2 + $0x47]] }
  0x6d   :  { %v474_v55 = vstv %s1331_s3  ;;  %v439_v41 = vadd.f32 %v435_v5, %v429_v47  ;;  %v440_v40 = vadd.f32 %v436_v6, %v430_v46  ;;  %v441_v8 = vadd.f32 %v437_v7, %v431_v27  ;;  %s1577_s30 = sld [smem:[#allocation2 + $0x4b]]  ;;  %s1579_s3 = sld [smem:[#allocation2 + $0x4c]] }
  0x6e   :  { %v442_v10 = vadd.f32 %v438_v53, %v432_v4  ;;  %v445_v11 = vmul.f32 %v444_v54, %v1185_v9  ;;  %v446_v37 = vmul.f32 %v444_v54, %v1187_v13  ;;  %v447_v12 = vmul.f32 %v444_v54, %v1189_v14 }
  0x6f   :  { %v448_v23 = vmul.f32 %v444_v54, %v1191_v50  ;;  %v455_v28 = vmul.f32 %v454_v45, %v1229_v31  ;;  %v456_v29 = vmul.f32 %v454_v45, %v1231_v33  ;;  %v457_v30 = vmul.f32 %v454_v45, %v1233_v34 }
  0x70   :  { %v458_v42 = vmul.f32 %v454_v45, %v1235_v32  ;;  %v449_v38 = vadd.f32 %v445_v11, %v439_v41  ;;  %v450_v43 = vadd.f32 %v446_v37, %v440_v40  ;;  %v451_v25 = vadd.f32 %v447_v12, %v441_v8 }
  0x71   :  { %v452_v26 = vadd.f32 %v448_v23, %v442_v10  ;;  %v465_v48 = vmul.f32 %v464_v36, %v1269_v44  ;;  %v466_v39 = vmul.f32 %v464_v36, %v1656_v49  ;;  %v467_v19 = vmul.f32 %v464_v36, %v1657_v51 }
  0x72   :  { %v468_v21 = vmul.f32 %v464_v36, %v1658_v20  ;;  %v459_v47 = vadd.f32 %v455_v28, %v449_v38  ;;  %v460_v46 = vadd.f32 %v456_v29, %v450_v43  ;;  %v461_v27 = vadd.f32 %v457_v30, %v451_v25 }
  0x73   :  { %v462_v4 = vadd.f32 %v458_v42, %v452_v26  ;;  %v475_v5 = vmul.f32 %v474_v55, %v1305_v24  ;;  %v476_v6 = vmul.f32 %v474_v55, %v1307_v2  ;;  %v477_v7 = vmul.f32 %v474_v55, %v1309_v3 }
  0x74   :  { %v478_v53 = vmul.f32 %v474_v55, %v1311_v35  ;;  %v469_v54 = vadd.f32 %v465_v48, %v459_v47  ;;  %v470_v45 = vadd.f32 %v466_v39, %v460_v46  ;;  %v471_v41 = vadd.f32 %v467_v19, %v461_v27 }
  0x75   :  { %v472_v40 = vadd.f32 %v468_v21, %v462_v4  ;;  %v484_v8 = vstv %s1357_s4  ;;  %v494_v10 = vstv %s1359_s5  ;;  %v504_v36 = vstv %s1361_s6  ;;  %s1581_s4 = sld [smem:[#allocation2 + $0x4d]]  ;;  %s1583_s5 = sld [smem:[#allocation2 + $0x4e]] }
  0x76   :  { %v510_v11 = vstv %s1363_s7  ;;  %v479_v37 = vadd.f32 %v475_v5, %v469_v54  ;;  %v480_v12 = vadd.f32 %v476_v6, %v470_v45  ;;  %v481_v23 = vadd.f32 %v477_v7, %v471_v41  ;;  %s905_s6 = sld [smem:[#allocation2 + $0x4f]]  ;;  %s906_s7 = sld [smem:[#allocation2 + $0x50]] }
  0x77   :  { %v482_v28 = vadd.f32 %v478_v53, %v472_v40  ;;  %v485_v55 = vmul.f32 %v484_v8, %v1341_v22  ;;  %v486_v29 = vmul.f32 %v484_v8, %v1343_v0  ;;  %v487_v30 = vmul.f32 %v484_v8, %v1345_v1 }
  0x78   :  { %v488_v42 = vmul.f32 %v484_v8, %v1347_v52  ;;  %v505_v38 = vmul.f32 %v504_v36, %v1073_v15  ;;  %v506_v43 = vmul.f32 %v504_v36, %v1075_v16  ;;  %v507_v25 = vmul.f32 %v504_v36, %v1077_v17 }
  0x79   :  { %v508_v26 = vmul.f32 %v504_v36, %v1079_v18  ;;  %v489_v48 = vadd.f32 %v485_v55, %v479_v37  ;;  %v490_v39 = vadd.f32 %v486_v29, %v480_v12  ;;  %v491_v19 = vadd.f32 %v487_v30, %v481_v23 }
  0x7a   :  { %v492_v21 = vadd.f32 %v488_v42, %v482_v28  ;;  %v511_v47 = vmul.f32 %v510_v11, %v1113_v59  ;;  %v512_v46 = vmul.f32 %v510_v11, %v1115_v60  ;;  %v513_v27 = vmul.f32 %v510_v11, %v1117_v61 }
  0x7b   :  { %v514_v4 = vmul.f32 %v510_v11, %v1119_v62  ;;  %v1405_v5 = vadd.f32 %v494_v10, %v489_v48  ;;  %v1407_v6 = vadd.f32 %v494_v10, %v490_v39  ;;  %v1409_v7 = vadd.f32 %v494_v10, %v491_v19 }
  0x7c   :  { %v1411_v53 = vadd.f32 %v494_v10, %v492_v21  ;;  %v515_v54 = vadd.f32 %v511_v47, %v505_v38  ;;  %v516_v45 = vadd.f32 %v512_v46, %v506_v43  ;;  %v517_v41 = vadd.f32 %v513_v27, %v507_v25 }
  0x7d   :  { %1659 = vst [vmem:[#allocation5_spill] sm:$0xff] %v1409_v7  ;;  %v518_v40 = vadd.f32 %v514_v4, %v508_v26  ;;  %v520_v12 = vstv %s1385_s8  ;;  %v530_v23 = vstv %s1387_s9  ;;  %v540_v10 = vstv %s1389_s10 }
  0x7e   :  { %1660 = vst [vmem:[#allocation6_spill] sm:$0xff] %v1411_v53  ;;  %v550_v28 = vstv %s1391_s11  ;;  %v521_v55 = vmul.f32 %v520_v12, %v1149_v56  ;;  %v522_v29 = vmul.f32 %v520_v12, %v1151_v57  ;;  %v523_v30 = vmul.f32 %v520_v12, %v1153_v58 }
  0x7f   :  { %v524_v42 = vmul.f32 %v520_v12, %v1155_v63  ;;  %v531_v38 = vmul.f32 %v530_v23, %v1185_v9  ;;  %v532_v43 = vmul.f32 %v530_v23, %v1187_v13  ;;  %v533_v25 = vmul.f32 %v530_v23, %v1189_v14 }
  0x80   :  { %v534_v26 = vmul.f32 %v530_v23, %v1191_v50  ;;  %v525_v48 = vadd.f32 %v521_v55, %v515_v54  ;;  %v526_v39 = vadd.f32 %v522_v29, %v516_v45  ;;  %v527_v19 = vadd.f32 %v523_v30, %v517_v41 }
  0x81   :  { %v528_v21 = vadd.f32 %v524_v42, %v518_v40  ;;  %v541_v47 = vmul.f32 %v540_v10, %v1229_v31  ;;  %v542_v46 = vmul.f32 %v540_v10, %v1231_v33  ;;  %v543_v27 = vmul.f32 %v540_v10, %v1233_v34 }
  0x82   :  { %v544_v4 = vmul.f32 %v540_v10, %v1235_v32  ;;  %v535_v12 = vadd.f32 %v531_v38, %v525_v48  ;;  %v536_v37 = vadd.f32 %v532_v43, %v526_v39  ;;  %v537_v11 = vadd.f32 %v533_v25, %v527_v19 }
  0x83   :  { %v538_v36 = vadd.f32 %v534_v26, %v528_v21  ;;  %v551_v54 = vmul.f32 %v550_v28, %v1269_v44  ;;  %v552_v45 = vmul.f32 %v550_v28, %v1656_v49  ;;  %v553_v41 = vmul.f32 %v550_v28, %v1657_v51 }
  0x84   :  { %v554_v40 = vmul.f32 %v550_v28, %v1658_v20  ;;  %v545_v23 = vadd.f32 %v541_v47, %v535_v12  ;;  %v546_v10 = vadd.f32 %v542_v46, %v536_v37  ;;  %v547_v55 = vadd.f32 %v543_v27, %v537_v11 }
  0x85   :  { %v548_v29 = vadd.f32 %v544_v4, %v538_v36  ;;  %v560_v30 = vstv %s1413_s12  ;;  %v570_v42 = vstv %s1419_s13  ;;  %v580_v38 = vstv %s1425_s17 }
  0x86   :  { %v590_v43 = vstv %s1427_s18  ;;  %v555_v25 = vadd.f32 %v551_v54, %v545_v23  ;;  %v556_v26 = vadd.f32 %v552_v45, %v546_v10  ;;  %v557_v48 = vadd.f32 %v553_v41, %v547_v55 }
  0x87   :  { %v558_v28 = vadd.f32 %v554_v40, %v548_v29  ;;  %v561_v39 = vmul.f32 %v560_v30, %v1305_v24  ;;  %v562_v19 = vmul.f32 %v560_v30, %v1307_v2  ;;  %v563_v37 = vmul.f32 %v560_v30, %v1309_v3 }
  0x88   :  { %v564_v36 = vmul.f32 %v560_v30, %v1311_v35  ;;  %v571_v11 = vmul.f32 %v570_v42, %v1341_v22  ;;  %v572_v21 = vmul.f32 %v570_v42, %v1343_v0  ;;  %v573_v47 = vmul.f32 %v570_v42, %v1345_v1 }
  0x89   :  { %v574_v46 = vmul.f32 %v570_v42, %v1347_v52  ;;  %v565_v27 = vadd.f32 %v561_v39, %v555_v25  ;;  %v566_v4 = vadd.f32 %v562_v19, %v556_v26  ;;  %v567_v12 = vadd.f32 %v563_v37, %v557_v48 }
  0x8a   :  { %v568_v54 = vadd.f32 %v564_v36, %v558_v28  ;;  %v591_v45 = vmul.f32 %v590_v43, %v1073_v15  ;;  %v592_v41 = vmul.f32 %v590_v43, %v1075_v16  ;;  %v593_v40 = vmul.f32 %v590_v43, %v1077_v17 }
  0x8b   :  { %v594_v23 = vmul.f32 %v590_v43, %v1079_v18  ;;  %v575_v10 = vadd.f32 %v571_v11, %v565_v27  ;;  %v576_v55 = vadd.f32 %v572_v21, %v566_v4  ;;  %v577_v29 = vadd.f32 %v573_v47, %v567_v12 }
  0x8c   :  { %v578_v30 = vadd.f32 %v574_v46, %v568_v54  ;;  %v596_v8 = vstv %s1445_s14  ;;  %v606_v53 = vstv %s1447_s0  ;;  %v616_v42 = vstv %s1449_s15 }
  0x8d   :  { %v626_v7 = vstv %s1451_s16  ;;  %v1473_v25 = vadd.f32 %v580_v38, %v575_v10  ;;  %v1475_v26 = vadd.f32 %v580_v38, %v576_v55  ;;  %v1477_v48 = vadd.f32 %v580_v38, %v577_v29 }
  0x8e   :  { %v1479_v28 = vadd.f32 %v580_v38, %v578_v30  ;;  %v597_v43 = vmul.f32 %v596_v8, %v1113_v59  ;;  %v598_v39 = vmul.f32 %v596_v8, %v1115_v60  ;;  %v599_v19 = vmul.f32 %v596_v8, %v1117_v61 }
  0x8f   :  { %1661 = vst [vmem:[#allocation7_spill] sm:$0xff] %v1473_v25  ;;  %1662 = vst [vmem:[#allocation8_spill] sm:$0xff] %v1475_v26  ;;  %v600_v37 = vmul.f32 %v596_v8, %v1119_v62  ;;  %v607_v12 = vmul.f32 %v606_v53, %v1149_v56  ;;  %v608_v8 = vmul.f32 %v606_v53, %v1151_v57  ;;  %v682_v26 = vstv %s1511_s26 }
  0x90   :  { %1663 = vst [vmem:[#allocation9_spill] sm:$0xff] %v1477_v48  ;;  %1664 = vst [vmem:[#allocation10_spill] sm:$0xff] %v1479_v28  ;;  %v601_v47 = vadd.f32 %v597_v43, %v591_v45  ;;  %v602_v46 = vadd.f32 %v598_v39, %v592_v41  ;;  %v603_v27 = vadd.f32 %v599_v19, %v593_v40  ;;  %v676_v48 = vstv %s1509_s23 }
  0x91   :  { %v604_v4 = vadd.f32 %v600_v37, %v594_v23  ;;  %v609_v54 = vmul.f32 %v606_v53, %v1153_v58  ;;  %v610_v10 = vmul.f32 %v606_v53, %v1155_v63  ;;  %v617_v55 = vmul.f32 %v616_v42, %v1185_v9 }
  0x92   :  { %v618_v29 = vmul.f32 %v616_v42, %v1187_v13  ;;  %v619_v30 = vmul.f32 %v616_v42, %v1189_v14  ;;  %v620_v21 = vmul.f32 %v616_v42, %v1191_v50  ;;  %v611_v45 = vadd.f32 %v607_v12, %v601_v47 }
  0x93   :  { %v612_v41 = vadd.f32 %v608_v8, %v602_v46  ;;  %v613_v40 = vadd.f32 %v609_v54, %v603_v27  ;;  %v614_v23 = vadd.f32 %v610_v10, %v604_v4  ;;  %v627_v43 = vmul.f32 %v626_v7, %v1229_v31 }
  0x94   :  { %v628_v53 = vmul.f32 %v626_v7, %v1231_v33  ;;  %v629_v39 = vmul.f32 %v626_v7, %v1233_v34  ;;  %v630_v19 = vmul.f32 %v626_v7, %v1235_v32  ;;  %v621_v42 = vadd.f32 %v617_v55, %v611_v45 }
  0x95   :  { %v622_v37 = vadd.f32 %v618_v29, %v612_v41  ;;  %v623_v47 = vadd.f32 %v619_v30, %v613_v40  ;;  %v624_v46 = vadd.f32 %v620_v21, %v614_v23  ;;  %v636_v27 = vstv %s1481_s19 }
  0x96   :  { %v646_v4 = vstv %s1483_s20  ;;  %v656_v12 = vstv %s1489_s21  ;;  %v666_v8 = vstv %s1491_s22  ;;  %v631_v54 = vadd.f32 %v627_v43, %v621_v42 }
  0x97   :  { %v632_v10 = vadd.f32 %v628_v53, %v622_v37  ;;  %v633_v11 = vadd.f32 %v629_v39, %v623_v47  ;;  %v634_v7 = vadd.f32 %v630_v19, %v624_v46  ;;  %v637_v38 = vmul.f32 %v636_v27, %v1269_v44 }
  0x98   :  { %v638_v36 = vmul.f32 %v636_v27, %v1656_v49  ;;  %v639_v55 = vmul.f32 %v636_v27, %v1657_v51  ;;  %v640_v21 = vmul.f32 %v636_v27, %v1658_v20  ;;  %v647_v29 = vmul.f32 %v646_v4, %v1305_v24 }
  0x99   :  { %v648_v30 = vmul.f32 %v646_v4, %v1307_v2  ;;  %v649_v45 = vmul.f32 %v646_v4, %v1309_v3  ;;  %v650_v41 = vmul.f32 %v646_v4, %v1311_v35  ;;  %v641_v40 = vadd.f32 %v637_v38, %v631_v54 }
  0x9a   :  { %v642_v23 = vadd.f32 %v638_v36, %v632_v10  ;;  %v643_v43 = vadd.f32 %v639_v55, %v633_v11  ;;  %v644_v53 = vadd.f32 %v640_v21, %v634_v7  ;;  %v657_v39 = vmul.f32 %v656_v12, %v1341_v22 }
  0x9b   :  { %v658_v19 = vmul.f32 %v656_v12, %v1343_v0  ;;  %v659_v42 = vmul.f32 %v656_v12, %v1345_v1  ;;  %v660_v37 = vmul.f32 %v656_v12, %v1347_v52  ;;  %v651_v47 = vadd.f32 %v647_v29, %v641_v40 }
  0x9c   :  { %v652_v46 = vadd.f32 %v648_v30, %v642_v23  ;;  %v653_v27 = vadd.f32 %v649_v45, %v643_v43  ;;  %v654_v28 = vadd.f32 %v650_v41, %v644_v53  ;;  %v692_v4 = vstv %s1513_s27 }
  0x9d   :  { %v702_v25 = vstv %s1515_s1  ;;  %v661_v38 = vadd.f32 %v657_v39, %v651_v47  ;;  %v677_v10 = vmul.f32 %v676_v48, %v1073_v15  ;;  %v678_v12 = vmul.f32 %v676_v48, %v1075_v16 }
  0x9e   :  { %v662_v36 = vadd.f32 %v658_v19, %v652_v46  ;;  %v663_v11 = vadd.f32 %v659_v42, %v653_v27  ;;  %v664_v54 = vadd.f32 %v660_v37, %v654_v28  ;;  %v679_v7 = vmul.f32 %v676_v48, %v1077_v17 }
  0x9f   :  { %v680_v55 = vmul.f32 %v676_v48, %v1079_v18  ;;  %v1549_v21 = vadd.f32 %v666_v8, %v661_v38  ;;  %v683_v15 = vmul.f32 %v682_v26, %v1113_v59  ;;  %v684_v16 = vmul.f32 %v682_v26, %v1115_v60 }
  0xa0   :  { %v1551_v29 = vadd.f32 %v666_v8, %v662_v36  ;;  %v1553_v28 = vadd.f32 %v666_v8, %v663_v11  ;;  %v1555_v30 = vadd.f32 %v666_v8, %v664_v54  ;;  %v685_v17 = vmul.f32 %v682_v26, %v1117_v61 }
  0xa1   :  { %v686_v18 = vmul.f32 %v682_v26, %v1119_v62  ;;  %v671_v48 = vmax.f32 %v1549_v21, 0.0  ;;  %v687_v23 = vadd.f32 %v683_v15, %v677_v10  ;;  %v688_v8 = vadd.f32 %v684_v16, %v678_v12 }
  0xa2   :  { %v672_v45 = vmax.f32 %v1551_v29, 0.0  ;;  %v673_v41 = vmax.f32 %v1553_v28, 0.0  ;;  %v674_v40 = vmax.f32 %v1555_v30, 0.0  ;;  %v689_v43 = vadd.f32 %v685_v17, %v679_v7 }
  0xa3   :  { %v690_v59 = vadd.f32 %v686_v18, %v680_v55  ;;  %v693_v60 = vmul.f32 %v692_v4, %v1149_v56  ;;  %v694_v61 = vmul.f32 %v692_v4, %v1151_v57  ;;  %v695_v62 = vmul.f32 %v692_v4, %v1153_v58 }
  0xa4   :  { %v696_v26 = vmul.f32 %v692_v4, %v1155_v63  ;;  %v703_v53 = vmul.f32 %v702_v25, %v1185_v9  ;;  %v704_v39 = vmul.f32 %v702_v25, %v1187_v13  ;;  %v705_v19 = vmul.f32 %v702_v25, %v1189_v14 }
  0xa5   :  { %v706_v42 = vmul.f32 %v702_v25, %v1191_v50  ;;  %v697_v37 = vadd.f32 %v693_v60, %v687_v23  ;;  %v698_v47 = vadd.f32 %v694_v61, %v688_v8  ;;  %v699_v46 = vadd.f32 %v695_v62, %v689_v43 }
  0xa6   :  { %v700_v27 = vadd.f32 %v696_v26, %v690_v59  ;;  %v712_v38 = vstv %s1537_s24  ;;  %v722_v56 = vstv %s1539_s25  ;;  %v732_v36 = vstv %s1545_s28 }
  0xa7   :  { %v742_v57 = vstv %s1547_s29  ;;  %v707_v58 = vadd.f32 %v703_v53, %v697_v37  ;;  %v708_v63 = vadd.f32 %v704_v39, %v698_v47  ;;  %v709_v9 = vadd.f32 %v705_v19, %v699_v46  ;;  %v1669_v47 = vld [vmem:[#allocation6_spill] sm:$0xff] }
  0xa8   :  { %v710_v13 = vadd.f32 %v706_v42, %v700_v27  ;;  %v713_v14 = vmul.f32 %v712_v38, %v1229_v31  ;;  %v714_v50 = vmul.f32 %v712_v38, %v1231_v33  ;;  %v715_v25 = vmul.f32 %v712_v38, %v1233_v34 }
  0xa9   :  { %v716_v4 = vmul.f32 %v712_v38, %v1235_v32  ;;  %v723_v11 = vmul.f32 %v722_v56, %v1269_v44  ;;  %v724_v54 = vmul.f32 %v722_v56, %v1656_v49  ;;  %v725_v10 = vmul.f32 %v722_v56, %v1657_v51 }
  0xaa   :  { %v726_v12 = vmul.f32 %v722_v56, %v1658_v20  ;;  %v717_v7 = vadd.f32 %v713_v14, %v707_v58  ;;  %v718_v55 = vadd.f32 %v714_v50, %v708_v63  ;;  %v719_v15 = vadd.f32 %v715_v25, %v709_v9  ;;  %v1671_v58 = vld [vmem:[#allocation7_spill] sm:$0xff]  ;;  %v1675_v50 = vld [vmem:[#allocation9_spill] sm:$0xff] }
  0xab   :  { %v720_v16 = vadd.f32 %v716_v4, %v710_v13  ;;  %v733_v31 = vmul.f32 %v732_v36, %v1305_v24  ;;  %v734_v33 = vmul.f32 %v732_v36, %v1307_v2  ;;  %v735_v34 = vmul.f32 %v732_v36, %v1309_v3  ;;  %v1673_v13 = vld [vmem:[#allocation8_spill] sm:$0xff]  ;;  %v1677_v4 = vld [vmem:[#allocation10_spill] sm:$0xff] }
  0xac   :  { %v736_v32 = vmul.f32 %v732_v36, %v1311_v35  ;;  %v727_v44 = vadd.f32 %v723_v11, %v717_v7  ;;  %v728_v49 = vadd.f32 %v724_v54, %v718_v55  ;;  %v729_v51 = vadd.f32 %v725_v10, %v719_v15 }
  0xad   :  { %v730_v20 = vadd.f32 %v726_v12, %v720_v16  ;;  %v743_v17 = vmul.f32 %v742_v57, %v1341_v22  ;;  %v744_v18 = vmul.f32 %v742_v57, %v1343_v0  ;;  %v745_v24 = vmul.f32 %v742_v57, %v1345_v1 }
  0xae   :  { %v746_v23 = vmul.f32 %v742_v57, %v1347_v52  ;;  %v737_v2 = vadd.f32 %v733_v31, %v727_v44  ;;  %v738_v8 = vadd.f32 %v734_v33, %v728_v49  ;;  %v739_v43 = vadd.f32 %v735_v34, %v729_v51  ;;  %v1667_v52 = vld [vmem:[#allocation5_spill] sm:$0xff] }
  0xaf   :  { %v740_v3 = vadd.f32 %v736_v32, %v730_v20  ;;  %v752_v59 = vstv %s1577_s30  ;;  %v762_v60 = vstv %s1579_s3  ;;  %v768_v35 = vstv %s1581_s4 }
  0xb0   :  { %v778_v61 = vstv %s1583_s5  ;;  %v747_v62 = vadd.f32 %v743_v17, %v737_v2  ;;  %v748_v26 = vadd.f32 %v744_v18, %v738_v8  ;;  %v749_v53 = vadd.f32 %v745_v24, %v739_v43 }
  0xb1   :  { %v750_v39 = vadd.f32 %v746_v23, %v740_v3  ;;  %v1665_v22 = vmax.f32 %v1405_v5, 0.0  ;;  %v1666_v1 = vmax.f32 %v1407_v6, 0.0  ;;  %v1668_v42 = vmax.f32 %v1667_v52, 0.0 }
  0xb2   :  { %v1670_v46 = vmax.f32 %v1669_v47, 0.0  ;;  %v753_v38 = vadd.f32 %v752_v59, %v747_v62  ;;  %v754_v56 = vadd.f32 %v752_v59, %v748_v26  ;;  %v755_v36 = vadd.f32 %v752_v59, %v749_v53 }
  0xb3   :  { %v763_v0 = vmul.f32 %v762_v60, %v1665_v22  ;;  %v764_v19 = vmul.f32 %v762_v60, %v1666_v1  ;;  %v765_v37 = vmul.f32 %v762_v60, %v1668_v42  ;;  %v756_v57 = vadd.f32 %v752_v59, %v750_v39 }
  0xb4   :  { %v766_v27 = vmul.f32 %v762_v60, %v1670_v46  ;;  %v1672_v63 = vmax.f32 %v1671_v58, 0.0  ;;  %v1674_v5 = vmax.f32 %v1673_v13, 0.0  ;;  %v1676_v6 = vmax.f32 %v1675_v50, 0.0 }
  0xb5   :  { %v1678_v11 = vmax.f32 %v1677_v4, 0.0  ;;  %v757_v10 = vmax.f32 %v753_v38, 0.0  ;;  %v758_v12 = vmax.f32 %v754_v56, 0.0  ;;  %v759_v7 = vmax.f32 %v755_v36, 0.0 }
  0xb6   :  { %v769_v9 = vmul.f32 %v768_v35, %v1672_v63  ;;  %v770_v14 = vmul.f32 %v768_v35, %v1674_v5  ;;  %v771_v25 = vmul.f32 %v768_v35, %v1676_v6  ;;  %v760_v55 = vmax.f32 %v756_v57, 0.0 }
  0xb7   :  { %v772_v54 = vmul.f32 %v768_v35, %v1678_v11  ;;  %v779_v34 = vmul.f32 %v778_v61, %v671_v48  ;;  %v780_v32 = vmul.f32 %v778_v61, %v672_v45  ;;  %v781_v44 = vmul.f32 %v778_v61, %v673_v41 }
  0xb8   :  { %v773_v15 = vadd.f32 %v769_v9, %v763_v0  ;;  %v774_v16 = vadd.f32 %v770_v14, %v764_v19  ;;  %v775_v31 = vadd.f32 %v771_v25, %v765_v37  ;;  %v782_v49 = vmul.f32 %v778_v61, %v674_v40 }
  0xb9   :  { %v776_v33 = vadd.f32 %v772_v54, %v766_v27  ;;  %v788_v51 = vstv %s905_s6  ;;  %v798_v21 = vstv %s906_s7 }
  0xba   :  { %v783_v20 = vadd.f32 %v779_v34, %v773_v15  ;;  %v784_v17 = vadd.f32 %v780_v32, %v774_v16  ;;  %v785_v18 = vadd.f32 %v781_v44, %v775_v31  ;;  %v789_v23 = vmul.f32 %v788_v51, %v757_v10 }
  0xbb   :  { %v786_v24 = vadd.f32 %v782_v49, %v776_v33  ;;  %v790_v2 = vmul.f32 %v788_v51, %v758_v12  ;;  %v791_v8 = vmul.f32 %v788_v51, %v759_v7  ;;  %v792_v43 = vmul.f32 %v788_v51, %v760_v55 }
  0xbc   :  { %v793_v48 = vadd.f32 %v789_v23, %v783_v20 }
  0xbd   :  { %v794_v3 = vadd.f32 %v790_v2, %v784_v17  ;;  %v795_v29 = vadd.f32 %v791_v8, %v785_v18  ;;  %v796_v45 = vadd.f32 %v792_v43, %v786_v24 }
  0xbe   :  { %v799_v59 = vadd.f32 %v798_v21, %v793_v48 }
  0xbf   :  { %v800_v28 = vadd.f32 %v798_v21, %v794_v3  ;;  %v801_v41 = vadd.f32 %v798_v21, %v795_v29  ;;  %v802_v60 = vadd.f32 %v798_v21, %v796_v45 }
  0xc0   :  { %803 = vst [vmem:[%s1643_s2] sm:$0xff] %v799_v59 }
  0xc1   :  { %804 = vst [vmem:[%s1643_s2 + $0x8] sm:$0xff] %v800_v28  ;;  %805 = vst [vmem:[%s1643_s2 + $0x10] sm:$0xff] %v801_v41 }
  0xc2   :  { %806 = vst [vmem:[%s1643_s2 + $0x18] sm:$0xff] %v802_v60 }
  0xc3   :  { %811 = vsyncpa [#allocation3], 1 }

</bundles_post_ra>
